<compile_context>
chip_gen: v7x
topology: tpu7x:2x2x1
jax: 0.10.0
libtpu: 0.0.40
codegen_flags: <defaults>
</compile_context>

<pallas_src>
import numpy as np
import jax
import jax.numpy as jnp
from jax.experimental import pallas as pl
from jax.experimental.pallas import tpu as pltpu


def diffusion_trainer_kernel(sa_ref, soma_ref, x0_ref, noise_ref, w_ref,
                             wscale_ref, temb_ref, loss_ref):
    """One grid step = one N block of the model output / loss.

    Single K block (tk == D): no accumulator scratch, no init/finalize phases.
    """
    n = pl.program_id(0)
    tn = loss_ref.shape[1]

    # q(x_t | x_0):  x_t = sqrt(alpha_bar_t) * x_0 + sqrt(1 - alpha_bar_t) * eps
    # (f32 on the VPU; full [B, D] -- it is the matmul LHS over K = D)
    x_t = sa_ref[...] * x0_ref[...] + soma_ref[...] * noise_ref[...]

    # Dequantize the int8 weight tile in registers (the HBM stream stays int8,
    # which is the point: W dominates bytes moved), then bf16 MXU matmul with
    # f32 accumulation.
    w_tile = w_ref[...].astype(jnp.bfloat16)                          # [D, tn]
    acc = jnp.dot(x_t.astype(jnp.bfloat16), w_tile,
                  preferred_element_type=jnp.float32)                 # [B, tn]

    pred = acc * wscale_ref[...] + temb_ref[...].astype(jnp.float32)  # [B, tn]

    # MSE target: reuse the full-width noise block already in VMEM instead of
    # streaming a second, N-tiled copy of noise.
    off = pl.multiple_of(n * tn, tn)
    target = noise_ref[:, pl.ds(off, tn)]
    diff = pred - target
    loss_ref[...] = (diff * diff).astype(loss_ref.dtype)   # mse, reduction='none'


def _default_n_blocks(D):
    # Two TensorCores (v7x): split the output (N) axis in two so megacore
    # sharding ('parallel') lets each TC stream half of W.  Single-TC v5e/v6e:
    # one grid step -- the split would be pure per-step overhead there.
    try:
        kind = jax.devices()[0].device_kind.lower()
    except Exception:
        kind = ""
    two_tc = ("v7" in kind) or ("7x" in kind)
    return 2 if (two_tc and D % 256 == 0) else 1


def gaussian_diffusion_trainer_loss(x_0, t, noise, sqrt_alphas_bar,
                                    sqrt_one_minus_alphas_bar,
                                    w_i8, w_scale, temb_table, *,
                                    n_blocks=None,
                                    w_tile_cap_bytes=4 << 20):
    B, C, H, W = x_0.shape
    D = C * H * W
    assert w_i8.shape == (D, D) and w_i8.dtype == jnp.int8
    assert w_scale.shape == (1, D)

    if n_blocks is None:
        n_blocks = _default_n_blocks(D)
    assert D % n_blocks == 0
    tn = D // n_blocks
    # VMEM guard for larger D: keep the (double-buffered) int8 W tile bounded
    # by adding more N blocks; each loss tile is still written exactly once and
    # the single K block means no accumulator is ever needed.
    while D * tn > w_tile_cap_bytes and tn % 256 == 0:
        tn //= 2
    assert D % tn == 0 and (tn == D or tn % 128 == 0)
    grid = (D // tn,)

    x0f = x_0.reshape(B, D).astype(jnp.float32)
    noisef = noise.reshape(B, D).astype(jnp.float32)

    # Per-timestep embedding gather (bf16 stream, ~B*D*2 bytes -- negligible).
    temb = temb_table[t].astype(jnp.bfloat16)                 # [B, D]

    # extract(v, t, x_shape): gather schedule coefficients -> per-batch scalars
    sa = sqrt_alphas_bar[t].astype(jnp.float32).reshape(B, 1)
    soma = sqrt_one_minus_alphas_bar[t].astype(jnp.float32).reshape(B, 1)

    cost = pl.CostEstimate(
        flops=2 * B * D * D + 8 * B * D,
        transcendentals=0,
        bytes_accessed=(D * D              # W (int8)
                        + D * 4            # per-column scale (f32)
                        + 2 * B * D * 4    # x_0 + noise (f32)
                        + B * D * 2        # time embedding (bf16)
                        + B * D * 4        # loss output (f32)
                        + 2 * B * 4))      # schedule scalars

    loss = pl.pallas_call(
        diffusion_trainer_kernel,
        out_shape=jax.ShapeDtypeStruct((B, D), jnp.float32),
        grid_spec=pltpu.PrefetchScalarGridSpec(
            num_scalar_prefetch=0,
            grid=grid,
            in_specs=[
                pl.BlockSpec((B, 1), lambda n: (0, 0)),      # sqrt_alphas_bar[t]
                pl.BlockSpec((B, 1), lambda n: (0, 0)),      # sqrt_one_minus_alphas_bar[t]
                pl.BlockSpec((B, D), lambda n: (0, 0)),      # x_0 (full K)
                pl.BlockSpec((B, D), lambda n: (0, 0)),      # noise (full K; also MSE target)
                pl.BlockSpec((D, tn), lambda n: (0, n)),     # model weight (int8)
                pl.BlockSpec((1, tn), lambda n: (0, n)),     # per-column weight scale (f32)
                pl.BlockSpec((B, tn), lambda n: (0, n)),     # time embedding (bf16)
            ],
            out_specs=pl.BlockSpec((B, tn), lambda n: (0, n)),
        ),
        compiler_params=pltpu.CompilerParams(
            dimension_semantics=("parallel",)),
        cost_estimate=cost,
    )(sa, soma, x0f, noisef, w_i8, w_scale, temb)

    return loss.reshape(B, C, H, W)


if __name__ == "__main__":
    # Diffusion schedule (computed in float64 like torch .double(), then cast)
    beta_1, beta_T, T = 1e-4, 0.02, 1000
    betas = np.linspace(beta_1, beta_T, T, dtype=np.float64)
    alphas = 1.0 - betas
    alphas_bar = np.cumprod(alphas, axis=0)
    sqrt_alphas_bar = jnp.asarray(np.sqrt(alphas_bar), dtype=jnp.float32)
    sqrt_one_minus_alphas_bar = jnp.asarray(np.sqrt(1.0 - alphas_bar),
                                            dtype=jnp.float32)

    # Shapes: B=8 fills the 8 vreg sublanes; D = C*H*W = 1024
    B, C, H, W = 8, 4, 16, 16
    D = C * H * W

    key = jax.random.PRNGKey(0)
    k_x0, k_t, k_noise, k_w, k_emb = jax.random.split(key, 5)

    # Synthetic model parameters: int8 weight + per-output-column f32 scale,
    # bf16 per-timestep embedding table.
    w_f32 = jax.random.normal(k_w, (D, D), dtype=jnp.float32) * 0.02
    w_scale = jnp.maximum(jnp.max(jnp.abs(w_f32), axis=0, keepdims=True),
                          1e-8) / 127.0                      # (1, D)
    w_i8 = jnp.clip(jnp.round(w_f32 / w_scale), -127, 127).astype(jnp.int8)
    temb_table = (jax.random.normal(k_emb, (T, D), dtype=jnp.float32)
                  * 0.1).astype(jnp.bfloat16)

    # Forward-pass inputs (torch.randint / torch.randn_like -> jax.random glue)
    x_0 = jax.random.normal(k_x0, (B, C, H, W), dtype=jnp.float32)
    t = jax.random.randint(k_t, (B,), 0, T, dtype=jnp.int32)
    noise = jax.random.normal(k_noise, (B, C, H, W), dtype=jnp.float32)

    loss = gaussian_diffusion_trainer_loss(
        x_0, t, noise, sqrt_alphas_bar, sqrt_one_minus_alphas_bar,
        w_i8, w_scale, temb_table)
    loss = jax.block_until_ready(loss)

    # Pure-JAX reference in the same precision: int8 weights dequantized to
    # bf16, f32 accumulation, per-column scale applied after the dot.
    sa_b = sqrt_alphas_bar[t].reshape(B, 1, 1, 1)
    soma_b = sqrt_one_minus_alphas_bar[t].reshape(B, 1, 1, 1)
    x_t_ref = sa_b * x_0 + soma_b * noise
    pred_ref = jnp.dot(x_t_ref.reshape(B, D).astype(jnp.bfloat16),
                       w_i8.astype(jnp.bfloat16),
                       preferred_element_type=jnp.float32) * w_scale
    pred_ref = pred_ref + temb_table[t].astype(jnp.float32)
    loss_ref = ((pred_ref - noise.reshape(B, D)) ** 2).reshape(B, C, H, W)

    np.testing.assert_allclose(np.asarray(loss), np.asarray(loss_ref),
                               rtol=5e-3, atol=5e-3)
    print("KERNEL_OK")
</pallas_src>

<mosaic_0001>
module attributes {stable_mosaic.version = 11 : i64} {
  func.func @diffusion_trainer_kernel(%arg0: i32, %arg1: memref<8x1xf32, #tpu.memory_space<vmem>>, %arg2: memref<8x1xf32, #tpu.memory_space<vmem>>, %arg3: memref<8x1024xf32, #tpu.memory_space<vmem>>, %arg4: memref<8x1024xf32, #tpu.memory_space<vmem>>, %arg5: memref<1024x1024xi8, #tpu.memory_space<vmem>>, %arg6: memref<1x1024xf32, #tpu.memory_space<vmem>>, %arg7: memref<8x1024xbf16, #tpu.memory_space<vmem>>, %arg8: memref<8x1024xf32, #tpu.memory_space<vmem>>) attributes {dimension_semantics = [#tpu.dimension_semantics<parallel>], iteration_bounds = array<i64: 1>, scalar_prefetch = 0 : i64, scratch_operands = 0 : i64, tpu.core_type = #tpu.core_type<tc>, window_params = [{pipeline_mode = #tpu.pipeline_mode<synchronous>, transform_indices = @transform_0, window_bounds = array<i64: 8, 1>}, {pipeline_mode = #tpu.pipeline_mode<synchronous>, transform_indices = @transform_1, window_bounds = array<i64: 8, 1>}, {pipeline_mode = #tpu.pipeline_mode<synchronous>, transform_indices = @transform_2, window_bounds = array<i64: 8, 1024>}, {pipeline_mode = #tpu.pipeline_mode<synchronous>, transform_indices = @transform_3, window_bounds = array<i64: 8, 1024>}, {transform_indices = @transform_4, window_bounds = array<i64: 1024, 1024>}, {transform_indices = @transform_5, window_bounds = array<i64: 1, 1024>}, {transform_indices = @transform_6, window_bounds = array<i64: 8, 1024>}, {transform_indices = @transform_7, window_bounds = array<i64: 8, 1024>}]} {
    %c0 = arith.constant 0 : index
    %c0_0 = arith.constant 0 : index
    %0 = vector.load %arg1[%c0, %c0_0] : memref<8x1xf32, #tpu.memory_space<vmem>>, vector<8x1xf32>
    %c0_1 = arith.constant 0 : index
    %c0_2 = arith.constant 0 : index
    %1 = vector.load %arg3[%c0_1, %c0_2] : memref<8x1024xf32, #tpu.memory_space<vmem>>, vector<8x1024xf32>
    %2 = vector.broadcast %0 : vector<8x1xf32> to vector<8x1024xf32>
    %3 = arith.mulf %2, %1 : vector<8x1024xf32>
    %c0_3 = arith.constant 0 : index
    %c0_4 = arith.constant 0 : index
    %4 = vector.load %arg2[%c0_3, %c0_4] : memref<8x1xf32, #tpu.memory_space<vmem>>, vector<8x1xf32>
    %c0_5 = arith.constant 0 : index
    %c0_6 = arith.constant 0 : index
    %5 = vector.load %arg4[%c0_5, %c0_6] : memref<8x1024xf32, #tpu.memory_space<vmem>>, vector<8x1024xf32>
    %6 = vector.broadcast %4 : vector<8x1xf32> to vector<8x1024xf32>
    %7 = arith.mulf %6, %5 : vector<8x1024xf32>
    %8 = arith.addf %3, %7 : vector<8x1024xf32>
    %c0_7 = arith.constant 0 : index
    %c0_8 = arith.constant 0 : index
    %9 = vector.load %arg5[%c0_7, %c0_8] : memref<1024x1024xi8, #tpu.memory_space<vmem>>, vector<1024x1024xi8>
    %10 = arith.sitofp %9 : vector<1024x1024xi8> to vector<1024x1024xbf16>
    %11 = arith.truncf %8 : vector<8x1024xf32> to vector<8x1024xbf16>
    %cst = arith.constant dense<0.000000e+00> : vector<8x1024xf32>
    %12 = tpu.matmul %11, %10, %cst {dimension_numbers = #tpu.dot_dimension_numbers<[1], [0], [0], [1], [0, 0, 1, 1], [], []>} : vector<8x1024xbf16>, vector<1024x1024xbf16>, vector<8x1024xf32> -> vector<8x1024xf32>
    %c0_9 = arith.constant 0 : index
    %c0_10 = arith.constant 0 : index
    %13 = vector.load %arg6[%c0_9, %c0_10] : memref<1x1024xf32, #tpu.memory_space<vmem>>, vector<1x1024xf32>
    %14 = vector.broadcast %13 : vector<1x1024xf32> to vector<8x1024xf32>
    %15 = arith.mulf %12, %14 : vector<8x1024xf32>
    %c0_11 = arith.constant 0 : index
    %c0_12 = arith.constant 0 : index
    %16 = vector.load %arg7[%c0_11, %c0_12] : memref<8x1024xbf16, #tpu.memory_space<vmem>>, vector<8x1024xbf16>
    %17 = arith.extf %16 : vector<8x1024xbf16> to vector<8x1024xf32>
    %18 = arith.addf %15, %17 : vector<8x1024xf32>
    %c1024_i32 = arith.constant 1024 : i32
    %19 = arith.muli %arg0, %c1024_i32 : i32
    %20 = tpu.assume_multiple %19, 1024 : i32
    %c0_13 = arith.constant 0 : index
    %21 = arith.index_cast %20 : i32 to index
    %22 = vector.load %arg4[%c0_13, %21] : memref<8x1024xf32, #tpu.memory_space<vmem>>, vector<8x1024xf32>
    %23 = arith.subf %18, %22 : vector<8x1024xf32>
    %24 = arith.mulf %23, %23 : vector<8x1024xf32>
    %c0_14 = arith.constant 0 : index
    %c0_15 = arith.constant 0 : index
    %25 = vector.load %arg8[%c0_14, %c0_15] : memref<8x1024xf32, #tpu.memory_space<vmem>>, vector<8x1024xf32>
    tpu.vector_store %arg8[%c0_14, %c0_15], %24 {strides = array<i32>} : memref<8x1024xf32, #tpu.memory_space<vmem>>, vector<8x1024xf32>,
    return
  }
  func.func @transform_0(%arg0: i32) -> (i32, i32) {
    %c0_i32 = arith.constant 0 : i32
    %c0_i32_0 = arith.constant 0 : i32
    %c0_i32_1 = arith.constant 0 : i32
    return %c0_i32, %c0_i32_0 : i32, i32
  }
  func.func @transform_1(%arg0: i32) -> (i32, i32) {
    %c0_i32 = arith.constant 0 : i32
    %c0_i32_0 = arith.constant 0 : i32
    %c0_i32_1 = arith.constant 0 : i32
    return %c0_i32, %c0_i32_0 : i32, i32
  }
  func.func @transform_2(%arg0: i32) -> (i32, i32) {
    %c0_i32 = arith.constant 0 : i32
    %c0_i32_0 = arith.constant 0 : i32
    %c0_i32_1 = arith.constant 0 : i32
    return %c0_i32, %c0_i32_0 : i32, i32
  }
  func.func @transform_3(%arg0: i32) -> (i32, i32) {
    %c0_i32 = arith.constant 0 : i32
    %c0_i32_0 = arith.constant 0 : i32
    %c0_i32_1 = arith.constant 0 : i32
    return %c0_i32, %c0_i32_0 : i32, i32
  }
  func.func @transform_4(%arg0: i32) -> (i32, i32) {
    %c0_i32 = arith.constant 0 : i32
    %c0_i32_0 = arith.constant 0 : i32
    return %c0_i32, %arg0 : i32, i32
  }
  func.func @transform_5(%arg0: i32) -> (i32, i32) {
    %c0_i32 = arith.constant 0 : i32
    %c0_i32_0 = arith.constant 0 : i32
    return %c0_i32, %arg0 : i32, i32
  }
  func.func @transform_6(%arg0: i32) -> (i32, i32) {
    %c0_i32 = arith.constant 0 : i32
    %c0_i32_0 = arith.constant 0 : i32
    return %c0_i32, %arg0 : i32, i32
  }
  func.func @transform_7(%arg0: i32) -> (i32, i32) {
    %c0_i32 = arith.constant 0 : i32
    %c0_i32_0 = arith.constant 0 : i32
    return %c0_i32, %arg0 : i32, i32
  }
}

</mosaic_0001>

<bundles_post_ra>
// kernel: tpu_custom_call.1
= control target key start
LH: loop header
LB: loop body
LE: loop exit
PB: predicated region body
PF: predicated region fallthrough
CT: control target
= control target key end

     0   :  { %12 = vsyncpa [#allocation3], 0  ;;  %s2035_s0 = inlined_call_operand.vmem [shape: f32[8,1], index: 0, kind: input, shape index: {}]   ;;  %s2036_s1 = inlined_call_operand.vmem [shape: f32[8,1], index: 1, kind: input, shape index: {}]   ;;  %s2037_s2 = inlined_call_operand.hbm [shape: f32[8,1024], index: 2, kind: input, shape index: {}]   ;;  %s2038_s3 = inlined_call_operand.hbm [shape: f32[8,1024], index: 3, kind: input, shape index: {}]   ;;  %s2039_s4 = inlined_call_operand.hbm [shape: s8[1024,1024], index: 4, kind: input, shape index: {}]   ;;  %s2040_s5 = inlined_call_operand.vmem [shape: f32[1,1024], index: 5, kind: input, shape index: {}]   ;;  %s2041_s6 = inlined_call_operand.vmem [shape: bf16[8,1024], index: 6, kind: input, shape index: {}]   ;;  %s2042_s7 = inlined_call_operand.hbm [shape: f32[8,1024], index: 7, kind: output, shape index: {}]  }
   0x1   :  { %13 = vsyncpa [#allocation6], 0 }
   0x2   :  { %14 = vsyncpa [#allocation4], 0  ;;  %s1823_s24 = smov [#allocation5]   ;;  %s1824_s26 = smov [#allocation2]  }
   0x3   :  { %s35_s25 = sshll.u32 %s1823_s24, 4  ;;  %s25_s27 = sshll.u32 %s1824_s26, 4  ;;  %s36_s25 = int_to_ptr.vmem [resolvable:$true] %s35_s25  ;;  %s26_s27 = int_to_ptr.vmem [resolvable:$true] %s25_s27 }
   0x4   :  { %s1729_s30 = scalar_lea.hbm %s2038_s3, 1024 }
   0x5   :  { %p1730_p0 = scmp.ne.s32.totalorder %s2038_s3, %s1729_s30  ;;  %p1733_p1 = scmp.lt.u32.totalorder %s1729_s30, %s2038_s3 }
   0x7   :  { %p1735_p2 = pnand %p1733_p1, %p1730_p0 }
   0x9   :  { %1738 = shalt.err (!%p1735_p2)
}
   0xa   :  { %s1739_s12 = scalar_lea.vmem %s36_s25, 1024  ;;  %p1744_p4 = scmp.lt.s32.totalorder %s36_s25, %s36_s25 }
   0xb   :  { %p1740_p3 = scmp.ne.s32.totalorder %s36_s25, %s1739_s12  ;;  %p1745_p5 = scmp.lt.s32.totalorder %s1739_s12, %s1739_s12 }
   0xd   :  { %p1746_p6 = por %p1745_p5, %p1744_p4 }
   0xf   :  { %p1747_p7 = pnand %p1746_p6, %p1740_p3 }
  0x11   :  { %1750 = shalt.err (!%p1747_p7)
}
  0x12   :  { %38 = dma.hbm_to_vmem [thread:$0]  %s2038_s3, 1024, %s36_s25, [#allocation6]  }
  0x13   :  { %s1751_s17 = scalar_lea.hbm %s2037_s2, 1024 }
  0x14   :  { %p1752_p8 = scmp.ne.s32.totalorder %s2037_s2, %s1751_s17  ;;  %p1755_p9 = scmp.lt.u32.totalorder %s1751_s17, %s2037_s2 }
  0x16   :  { %p1757_p10 = pnand %p1755_p9, %p1752_p8 }
  0x18   :  { %1760 = shalt.err (!%p1757_p10)
}
  0x19   :  { %s1761_s22 = scalar_lea.vmem %s26_s27, 1024  ;;  %p1766_p12 = scmp.lt.s32.totalorder %s26_s27, %s26_s27 }
  0x1a   :  { %p1762_p11 = scmp.ne.s32.totalorder %s26_s27, %s1761_s22  ;;  %p1767_p13 = scmp.lt.s32.totalorder %s1761_s22, %s1761_s22 }
  0x1c   :  { %p1768_p0 = por %p1767_p13, %p1766_p12 }
  0x1e   :  { %p1769_p1 = pnand %p1768_p0, %p1762_p11 }
  0x20   :  { %1772 = shalt.err (!%p1769_p1)
}
  0x21   :  { %28 = dma.hbm_to_vmem [thread:$0]  %s2037_s2, 1024, %s26_s27, [#allocation3]  }
  0x22   :  { %s1825_s24 = smov [#allocation7]   ;;  %s1773_s29 = scalar_lea.hbm %s2039_s4, 32768 }
  0x23   :  { %s44_s25 = sshll.u32 %s1825_s24, 4  ;;  %p1774_p2 = scmp.ne.s32.totalorder %s2039_s4, %s1773_s29  ;;  %s45_s25 = int_to_ptr.vmem [resolvable:$true] %s44_s25 }
  0x24   :  { %p1777_p3 = scmp.lt.u32.totalorder %s1773_s29, %s2039_s4 }
  0x26   :  { %p1779_p4 = pnand %p1777_p3, %p1774_p2 }
  0x28   :  { %1782 = shalt.err (!%p1779_p4)
}
  0x29   :  { %s1783_s11 = scalar_lea.vmem %s45_s25, 32768  ;;  %p1788_p6 = scmp.lt.s32.totalorder %s45_s25, %s45_s25 }
  0x2a   :  { %p1784_p5 = scmp.ne.s32.totalorder %s45_s25, %s1783_s11  ;;  %p1789_p7 = scmp.lt.s32.totalorder %s1783_s11, %s1783_s11 }
  0x2c   :  { %p1790_p8 = por %p1789_p7, %p1788_p6 }
  0x2e   :  { %p1791_p9 = pnand %p1790_p8, %p1784_p5 }
  0x30   :  { %1794 = shalt.err (!%p1791_p9)
}
  0x31   :  { %s1826_s2 = smov 1024   ;;  %s1827_s27 = smov 64  }
  0x32   :  { %50 = dma.hbm_to_vmem [thread:$0]  %s2039_s4, 32768, %s45_s25, [#allocation6], %s1826_s2, %s1826_s2, %s1827_s27  }
  0x33   :  { %1817 = dma.done.wait [#allocation3], 1024  }
  0x34   :  { %1818 = vsyncadd [#allocation3], 4294966272 }
  0x35   :  { %1819 = dma.done.wait [#allocation6], 33792  }
  0x36   :  { %1820 = vsyncadd [#allocation6], 4294933504  ;;  %v1828_v0 = vmov 0   ;;  %v64_v1 = vld [vmem:[%s2035_s0] sm:$0xff]  ;;  %v117_v2 = vld [vmem:[#allocation7 + $0x8] sm:$0xff] }
  0x37   :  { %1728 = vset.pattern.permute.xlu0 %v1828_v0  ;;  %v373_v3 = vunpack.c.l.s8.bf16 %v117_v2  ;;  %v119_v4 = vld [vmem:[#allocation7 + $0x18] sm:$0xff]  ;;  %v116_v5 = vld [vmem:[#allocation7] sm:$0xff]  ;;  %v118_v6 = vld [vmem:[#allocation7 + $0x10] sm:$0xff]  ;;  %v381_v8 = vunpack.c.h.s8.bf16 %v117_v2 }
  0x38   :  { %75 = vperm.xlu0 %1728, %v64_v1   ;;  %v86_v7 = vld [vmem:[%s2036_s1] sm:$0xff]  ;;  %v375_v9 = vunpack.c.l.s8.bf16 %v119_v4  ;;  %v383_v10 = vunpack.c.h.s8.bf16 %v119_v4  ;;  %v372_v11 = vunpack.c.l.s8.bf16 %v116_v5  ;;  %v125_v12 = vld [vmem:[#allocation7 + $0x48] sm:$0xff]  ;;  %v374_v13 = vunpack.c.l.s8.bf16 %v118_v6  ;;  %v127_v14 = vld [vmem:[#allocation7 + $0x58] sm:$0xff] }
  0x39   :  { %892 = vmatprep.subr.bf16.mxu0 %v373_v3  ;;  %v380_v15 = vunpack.c.h.s8.bf16 %v116_v5  ;;  %v382_v16 = vunpack.c.h.s8.bf16 %v118_v6  ;;  %v389_v17 = vunpack.c.l.s8.bf16 %v125_v12  ;;  %v124_v18 = vld [vmem:[#allocation7 + $0x40] sm:$0xff]  ;;  %v391_v19 = vunpack.c.l.s8.bf16 %v127_v14  ;;  %v126_v20 = vld [vmem:[#allocation7 + $0x50] sm:$0xff]  ;;  %v133_v25 = vld [vmem:[#allocation7 + $0x88] sm:$0xff] }
  0x3a   :  { %1056 = vmatprep.subr.bf16.mxu1 %v375_v9  ;;  %893 = vmatpush1.bf16.msra.mxu0 %v372_v11  ;;  %v388_v21 = vunpack.c.l.s8.bf16 %v124_v18  ;;  %v390_v22 = vunpack.c.l.s8.bf16 %v126_v20  ;;  %v397_v23 = vunpack.c.h.s8.bf16 %v125_v12  ;;  %v399_v24 = vunpack.c.h.s8.bf16 %v127_v14  ;;  %v135_v26 = vld [vmem:[#allocation7 + $0x98] sm:$0xff]  ;;  %v132_v30 = vld [vmem:[#allocation7 + $0x80] sm:$0xff]  ;;  %v134_v32 = vld [vmem:[#allocation7 + $0x90] sm:$0xff] }
  0x3b   :  { %1057 = vmatpush1.bf16.msra.mxu1 %v374_v13  ;;  %894 = vmatprep.subr.bf16.mxu0 %v381_v8  ;;  %v396_v27 = vunpack.c.h.s8.bf16 %v124_v18  ;;  %v398_v28 = vunpack.c.h.s8.bf16 %v126_v20  ;;  %v405_v29 = vunpack.c.l.s8.bf16 %v133_v25  ;;  %v407_v31 = vunpack.c.l.s8.bf16 %v135_v26  ;;  %v141_v37 = vld [vmem:[#allocation7 + $0xc8] sm:$0xff]  ;;  %v143_v38 = vld [vmem:[#allocation7 + $0xd8] sm:$0xff]  ;;  %v140_v42 = vld [vmem:[#allocation7 + $0xc0] sm:$0xff] }
  0x3c   :  { %97 = vperm.xlu0 %1728, %v86_v7   ;;  %1058 = vmatprep.subr.bf16.mxu1 %v383_v10  ;;  %v404_v33 = vunpack.c.l.s8.bf16 %v132_v30  ;;  %v406_v34 = vunpack.c.l.s8.bf16 %v134_v32  ;;  %v413_v35 = vunpack.c.h.s8.bf16 %v133_v25  ;;  %v415_v36 = vunpack.c.h.s8.bf16 %v135_v26  ;;  %v142_v44 = vld [vmem:[#allocation7 + $0xd0] sm:$0xff]  ;;  %v149_v49 = vld [vmem:[#allocation7 + $0x108] sm:$0xff]  ;;  %v151_v50 = vld [vmem:[#allocation7 + $0x118] sm:$0xff] }
  0x3d   :  { %v412_v39 = vunpack.c.h.s8.bf16 %v132_v30  ;;  %v414_v40 = vunpack.c.h.s8.bf16 %v134_v32  ;;  %v421_v41 = vunpack.c.l.s8.bf16 %v141_v37  ;;  %v423_v43 = vunpack.c.l.s8.bf16 %v143_v38  ;;  %v148_v54 = vld [vmem:[#allocation7 + $0x100] sm:$0xff]  ;;  %v150_v56 = vld [vmem:[#allocation7 + $0x110] sm:$0xff]  ;;  %v157_v61 = vld [vmem:[#allocation7 + $0x148] sm:$0xff] }
  0x3e   :  { %895 = vmatpush1.bf16.msra.mxu0 %v380_v15  ;;  %v420_v45 = vunpack.c.l.s8.bf16 %v140_v42  ;;  %v422_v46 = vunpack.c.l.s8.bf16 %v142_v44  ;;  %v429_v47 = vunpack.c.h.s8.bf16 %v141_v37  ;;  %v431_v48 = vunpack.c.h.s8.bf16 %v143_v38  ;;  %v159_v62 = vld [vmem:[#allocation7 + $0x158] sm:$0xff]  ;;  %v156_v2 = vld [vmem:[#allocation7 + $0x140] sm:$0xff]  ;;  %v158_v4 = vld [vmem:[#allocation7 + $0x150] sm:$0xff] }
  0x3f   :  { %1059 = vmatpush1.bf16.msra.mxu1 %v382_v16  ;;  %896 = vmatprep.subr.bf16.mxu0 %v389_v17  ;;  %v428_v51 = vunpack.c.h.s8.bf16 %v140_v42  ;;  %v430_v52 = vunpack.c.h.s8.bf16 %v142_v44  ;;  %v437_v53 = vunpack.c.l.s8.bf16 %v149_v49  ;;  %v439_v55 = vunpack.c.l.s8.bf16 %v151_v50  ;;  %v165_v9 = vld [vmem:[#allocation7 + $0x188] sm:$0xff]  ;;  %v167_v10 = vld [vmem:[#allocation7 + $0x198] sm:$0xff]  ;;  %v164_v14 = vld [vmem:[#allocation7 + $0x180] sm:$0xff] }
  0x40   :  { %1060 = vmatprep.subr.bf16.mxu1 %v391_v19  ;;  %v436_v57 = vunpack.c.l.s8.bf16 %v148_v54  ;;  %v438_v58 = vunpack.c.l.s8.bf16 %v150_v56  ;;  %v445_v59 = vunpack.c.h.s8.bf16 %v149_v49  ;;  %v447_v60 = vunpack.c.h.s8.bf16 %v151_v50  ;;  %v166_v16 = vld [vmem:[#allocation7 + $0x190] sm:$0xff]  ;;  %v172_v26 = vld [vmem:[#allocation7 + $0x1c0] sm:$0xff]  ;;  %v68_v44 = vld [vmem:[#allocation2 + $0x18] sm:$0xff] }
  0x41   :  { %v444_v63 = vunpack.c.h.s8.bf16 %v148_v54  ;;  %v446_v0 = vunpack.c.h.s8.bf16 %v150_v56  ;;  %v453_v1 = vunpack.c.l.s8.bf16 %v157_v61  ;;  %v455_v3 = vunpack.c.l.s8.bf16 %v159_v62  ;;  %v65_v42 = vld [vmem:[#allocation2] sm:$0xff]  ;;  %v92_v49 = vld [vmem:[#allocation5 + $0x28] sm:$0xff] }
  0x42   :  { %897 = vmatpush1.bf16.msra.mxu0 %v388_v21  ;;  %v452_v5 = vunpack.c.l.s8.bf16 %v156_v2  ;;  %v454_v6 = vunpack.c.l.s8.bf16 %v158_v4  ;;  %v461_v7 = vunpack.c.h.s8.bf16 %v157_v61  ;;  %v463_v8 = vunpack.c.h.s8.bf16 %v159_v62  ;;  %v173_v21 = vld [vmem:[#allocation7 + $0x1c8] sm:$0xff]  ;;  %v69_v50 = vld [vmem:[#allocation2 + $0x20] sm:$0xff]  ;;  %v182_v62 = vld [vmem:[#allocation7 + $0x210] sm:$0xff] }
  0x43   :  { %1061 = vmatpush1.bf16.msra.mxu1 %v390_v22  ;;  %898 = vmatprep.subr.bf16.mxu0 %v397_v23  ;;  %v460_v11 = vunpack.c.h.s8.bf16 %v156_v2  ;;  %v462_v12 = vunpack.c.h.s8.bf16 %v158_v4  ;;  %v469_v13 = vunpack.c.l.s8.bf16 %v165_v9  ;;  %v471_v15 = vunpack.c.l.s8.bf16 %v167_v10  ;;  %v175_v22 = vld [vmem:[#allocation7 + $0x1d8] sm:$0xff]  ;;  %v180_v61 = vld [vmem:[#allocation7 + $0x200] sm:$0xff] }
  0x44   :  { %1062 = vmatprep.subr.bf16.mxu1 %v399_v24  ;;  %v468_v17 = vunpack.c.l.s8.bf16 %v164_v14  ;;  %v470_v18 = vunpack.c.l.s8.bf16 %v166_v16  ;;  %v477_v19 = vunpack.c.h.s8.bf16 %v165_v9  ;;  %v479_v20 = vunpack.c.h.s8.bf16 %v167_v10  ;;  %v93_v9 = vld [vmem:[#allocation5 + $0x30] sm:$0xff] }
  0x45   :  { %v476_v23 = vunpack.c.h.s8.bf16 %v164_v14  ;;  %v478_v24 = vunpack.c.h.s8.bf16 %v166_v16  ;;  %v485_v25 = vunpack.c.l.s8.bf16 %v173_v21  ;;  %v495_v32 = vunpack.c.h.s8.bf16 %v175_v22 }
  0x46   :  { %899 = vmatpush1.bf16.msra.mxu0 %v396_v27  ;;  %v487_v27 = vunpack.c.l.s8.bf16 %v175_v22  ;;  %v502_v16 = vunpack.c.l.s8.bf16 %v182_v62 }
  0x47   :  { %1063 = vmatpush1.bf16.msra.mxu1 %v398_v28  ;;  %900 = vmatprep.subr.bf16.mxu0 %v405_v29  ;;  %v174_v28 = vld [vmem:[#allocation7 + $0x1d0] sm:$0xff]  ;;  %v484_v29 = vunpack.c.l.s8.bf16 %v172_v26 }
  0x48   :  { %1064 = vmatprep.subr.bf16.mxu1 %v407_v31  ;;  %v486_v30 = vunpack.c.l.s8.bf16 %v174_v28  ;;  %v493_v31 = vunpack.c.h.s8.bf16 %v173_v21 }
  0x4a   :  { %901 = vmatpush1.bf16.msra.mxu0 %v404_v33  ;;  %v1912_v33 = vld [vmem:[#allocation7 + $0x208] sm:$0xff] }
  0x4b   :  { %1065 = vmatpush1.bf16.msra.mxu1 %v406_v34  ;;  %902 = vmatprep.subr.bf16.mxu0 %v413_v35  ;;  %v1914_v34 = vld [vmem:[#allocation7 + $0x218] sm:$0xff]  ;;  %v492_v35 = vunpack.c.h.s8.bf16 %v172_v26  ;;  %v501_v37 = vunpack.c.l.s8.bf16 %v1912_v33  ;;  %v509_v21 = vunpack.c.h.s8.bf16 %v1912_v33  ;;  %v190_v33 = vld [vmem:[#allocation7 + $0x250] sm:$0xff] }
  0x4c   :  { %1066 = vmatprep.subr.bf16.mxu1 %v415_v36  ;;  %v494_v36 = vunpack.c.h.s8.bf16 %v174_v28  ;;  %v503_v38 = vunpack.c.l.s8.bf16 %v1914_v34  ;;  %v511_v22 = vunpack.c.h.s8.bf16 %v1914_v34  ;;  %v508_v28 = vunpack.c.h.s8.bf16 %v180_v61 }
  0x4e   :  { %903 = vmatpush1.bf16.msra.mxu0 %v412_v39 }
  0x4f   :  { %1067 = vmatpush1.bf16.msra.mxu1 %v414_v40  ;;  %904 = vmatprep.subr.bf16.mxu0 %v421_v41  ;;  %v66_v40 = vld [vmem:[#allocation2 + $0x8] sm:$0xff] }
  0x50   :  { %1068 = vmatprep.subr.bf16.mxu1 %v423_v43  ;;  %v88_v41 = vld [vmem:[#allocation5 + $0x8] sm:$0xff]  ;;  %v87_v43 = vld [vmem:[#allocation5] sm:$0xff] }
  0x52   :  { %905 = vmatpush1.bf16.msra.mxu0 %v420_v45  ;;  %v67_v45 = vld [vmem:[#allocation2 + $0x10] sm:$0xff] }
  0x53   :  { %1069 = vmatpush1.bf16.msra.mxu1 %v422_v46  ;;  %906 = vmatprep.subr.bf16.mxu0 %v429_v47  ;;  %v90_v46 = vld [vmem:[#allocation5 + $0x18] sm:$0xff]  ;;  %v89_v47 = vld [vmem:[#allocation5 + $0x10] sm:$0xff] }
  0x54   :  { %1070 = vmatprep.subr.bf16.mxu1 %v431_v48  ;;  %v70_v48 = vld [vmem:[#allocation2 + $0x28] sm:$0xff] }
  0x56   :  { %907 = vmatpush1.bf16.msra.mxu0 %v428_v51  ;;  %v91_v51 = vld [vmem:[#allocation5 + $0x20] sm:$0xff] }
  0x57   :  { %1071 = vmatpush1.bf16.msra.mxu1 %v430_v52  ;;  %908 = vmatprep.subr.bf16.mxu0 %v437_v53 }
  0x58   :  { %1072 = vmatprep.subr.bf16.mxu1 %v439_v55 }
  0x5a   :  { %909 = vmatpush1.bf16.msra.mxu0 %v436_v57 }
  0x5b   :  { %1073 = vmatpush1.bf16.msra.mxu1 %v438_v58  ;;  %910 = vmatprep.subr.bf16.mxu0 %v445_v59 }
  0x5c   :  { %1074 = vmatprep.subr.bf16.mxu1 %v447_v60 }
  0x5e   :  { %911 = vmatpush1.bf16.msra.mxu0 %v444_v63 }
  0x5f   :  { %1075 = vmatpush1.bf16.msra.mxu1 %v446_v0  ;;  %912 = vmatprep.subr.bf16.mxu0 %v453_v1 }
  0x60   :  { %1076 = vmatprep.subr.bf16.mxu1 %v455_v3  ;;  %v72_v3 = vld [vmem:[#allocation2 + $0x38] sm:$0xff] }
  0x62   :  { %913 = vmatpush1.bf16.msra.mxu0 %v452_v5 }
  0x63   :  { %1077 = vmatpush1.bf16.msra.mxu1 %v454_v6  ;;  %914 = vmatprep.subr.bf16.mxu0 %v461_v7  ;;  %v94_v7 = vld [vmem:[#allocation5 + $0x38] sm:$0xff] }
  0x64   :  { %1078 = vmatprep.subr.bf16.mxu1 %v463_v8  ;;  %v71_v8 = vld [vmem:[#allocation2 + $0x30] sm:$0xff] }
  0x66   :  { %915 = vmatpush1.bf16.msra.mxu0 %v460_v11 }
  0x67   :  { %1079 = vmatpush1.bf16.msra.mxu1 %v462_v12  ;;  %916 = vmatprep.subr.bf16.mxu0 %v469_v13 }
  0x68   :  { %1080 = vmatprep.subr.bf16.mxu1 %v471_v15  ;;  %v500_v15 = vunpack.c.l.s8.bf16 %v180_v61 }
  0x6a   :  { %917 = vmatpush1.bf16.msra.mxu0 %v468_v17 }
  0x6b   :  { %1081 = vmatpush1.bf16.msra.mxu1 %v470_v18  ;;  %918 = vmatprep.subr.bf16.mxu0 %v477_v19 }
  0x6c   :  { %1082 = vmatprep.subr.bf16.mxu1 %v479_v20 }
  0x6e   :  { %919 = vmatpush1.bf16.msra.mxu0 %v476_v23  ;;  %v189_v23 = vld [vmem:[#allocation7 + $0x248] sm:$0xff] }
  0x6f   :  { %1083 = vmatpush1.bf16.msra.mxu1 %v478_v24  ;;  %920 = vmatprep.subr.bf16.mxu0 %v485_v25  ;;  %v191_v24 = vld [vmem:[#allocation7 + $0x258] sm:$0xff] }
  0x70   :  { %1084 = vmatprep.subr.bf16.mxu1 %v487_v27 }
  0x72   :  { %921 = vmatpush1.bf16.msra.mxu0 %v484_v29  ;;  %v510_v29 = vunpack.c.h.s8.bf16 %v182_v62  ;;  %v213_v62 = vld [vmem:[#allocation7 + $0x308] sm:$0xff] }
  0x73   :  { %1085 = vmatpush1.bf16.msra.mxu1 %v486_v30  ;;  %922 = vmatprep.subr.bf16.mxu0 %v493_v31  ;;  %v517_v30 = vunpack.c.l.s8.bf16 %v189_v23  ;;  %v519_v31 = vunpack.c.l.s8.bf16 %v191_v24 }
  0x74   :  { %1086 = vmatprep.subr.bf16.mxu1 %v495_v32  ;;  %v188_v32 = vld [vmem:[#allocation7 + $0x240] sm:$0xff] }
  0x75   :  { %v516_v34 = vunpack.c.l.s8.bf16 %v188_v32 }
  0x76   :  { %923 = vmatpush1.bf16.msra.mxu0 %v492_v35  ;;  %v518_v35 = vunpack.c.l.s8.bf16 %v190_v33 }
  0x77   :  { %1087 = vmatpush1.bf16.msra.mxu1 %v494_v36  ;;  %933 = vmatprep.subr.bf16.mxu0 %v501_v37  ;;  %v525_v36 = vunpack.c.h.s8.bf16 %v189_v23  ;;  %v527_v37 = vunpack.c.h.s8.bf16 %v191_v24 }
  0x78   :  { %1097 = vmatprep.subr.bf16.mxu1 %v503_v38  ;;  %v197_v38 = vld [vmem:[#allocation7 + $0x288] sm:$0xff] }
  0xb7   :  { %v76_v39 = vpop.permute.xlu0 %75 }
  0xb8   :  { %v79_v53 = vmul.f32 %v76_v39, %v66_v40  ;;  %v78_v54 = vmul.f32 %v76_v39, %v65_v42  ;;  %v81_v55 = vmul.f32 %v76_v39, %v68_v44  ;;  %v80_v56 = vmul.f32 %v76_v39, %v67_v45  ;;  %v196_v44 = vld [vmem:[#allocation7 + $0x280] sm:$0xff]  ;;  %v198_v45 = vld [vmem:[#allocation7 + $0x290] sm:$0xff] }
  0xb9   :  { %v83_v63 = vmul.f32 %v76_v39, %v70_v48  ;;  %v82_v1 = vmul.f32 %v76_v39, %v69_v50  ;;  %v85_v17 = vmul.f32 %v76_v39, %v72_v3  ;;  %v84_v19 = vmul.f32 %v76_v39, %v71_v8  ;;  %v199_v39 = vld [vmem:[#allocation7 + $0x298] sm:$0xff]  ;;  %v205_v50 = vld [vmem:[#allocation7 + $0x2c8] sm:$0xff] }
  0xba   :  { %v524_v40 = vunpack.c.h.s8.bf16 %v188_v32  ;;  %v533_v42 = vunpack.c.l.s8.bf16 %v197_v38  ;;  %v541_v48 = vunpack.c.h.s8.bf16 %v197_v38 }
  0xbb   :  { %v98_v52 = vpop.permute.xlu0 %97 }
  0xbc   :  { %v101_v57 = vmul.f32 %v98_v52, %v88_v41  ;;  %v100_v58 = vmul.f32 %v98_v52, %v87_v43  ;;  %v103_v59 = vmul.f32 %v98_v52, %v90_v46  ;;  %v102_v60 = vmul.f32 %v98_v52, %v89_v47 }
  0xbd   :  { %v105_v0 = vmul.f32 %v98_v52, %v92_v49  ;;  %v104_v2 = vmul.f32 %v98_v52, %v91_v51  ;;  %v107_v18 = vmul.f32 %v98_v52, %v94_v7  ;;  %v106_v20 = vmul.f32 %v98_v52, %v93_v9  ;;  %v207_v51 = vld [vmem:[#allocation7 + $0x2d8] sm:$0xff] }
  0xbe   :  { %v109_v4 = vadd.f32 %v101_v57, %v79_v53  ;;  %v108_v5 = vadd.f32 %v100_v58, %v78_v54  ;;  %v1918_v6 = vadd.f32 %v102_v60, %v80_v56  ;;  %v111_v10 = vadd.f32 %v103_v59, %v81_v55  ;;  %v204_v56 = vld [vmem:[#allocation7 + $0x2c0] sm:$0xff]  ;;  %v206_v57 = vld [vmem:[#allocation7 + $0x2d0] sm:$0xff] }
  0xbf   :  { %v1920_v11 = vadd.f32 %v105_v0, %v83_v63  ;;  %v1922_v12 = vadd.f32 %v104_v2, %v82_v1  ;;  %v1936_v26 = vadd.f32 %v107_v18, %v85_v17  ;;  %v1938_v27 = vadd.f32 %v106_v20, %v84_v19  ;;  %v215_v63 = vld [vmem:[#allocation7 + $0x318] sm:$0xff] }
  0xc0   :  { %v1924_v13 = vpack.c.bf16 %v109_v4, %v109_v4  ;;  %v1926_v14 = vpack.c.bf16 %v108_v5, %v108_v5  ;;  %v1934_v25 = vpack.c.bf16 %v111_v10, %v111_v10  ;;  %v526_v41 = vunpack.c.h.s8.bf16 %v190_v33  ;;  %v212_v4 = vld [vmem:[#allocation7 + $0x300] sm:$0xff]  ;;  %v214_v5 = vld [vmem:[#allocation7 + $0x310] sm:$0xff] }
  0xc1   :  { %v535_v43 = vunpack.c.l.s8.bf16 %v199_v39  ;;  %v532_v46 = vunpack.c.l.s8.bf16 %v196_v44  ;;  %v534_v47 = vunpack.c.l.s8.bf16 %v198_v45  ;;  %v543_v49 = vunpack.c.h.s8.bf16 %v199_v39 }
  0xc2   :  { %924 = vmatprep.mubr.bf16.mxu0 %v1924_v13  ;;  %1088 = vmatprep.mubr.bf16.mxu1 %v1924_v13  ;;  %v540_v52 = vunpack.c.h.s8.bf16 %v196_v44  ;;  %v542_v53 = vunpack.c.h.s8.bf16 %v198_v45  ;;  %v549_v54 = vunpack.c.l.s8.bf16 %v205_v50  ;;  %v551_v55 = vunpack.c.l.s8.bf16 %v207_v51 }
  0xc3   :  { %925 = vmatmul.mubr.bf16.vlgmr.msra.gmra.mrb[0].mxu0 %v1926_v14  ;;  %1089 = vmatmul.mubr.bf16.vlgmr.msra.gmra.mrb[0].mxu1 %v1926_v14  ;;  %v548_v58 = vunpack.c.l.s8.bf16 %v204_v56  ;;  %v550_v59 = vunpack.c.l.s8.bf16 %v206_v57  ;;  %v557_v60 = vunpack.c.h.s8.bf16 %v205_v50  ;;  %v559_v61 = vunpack.c.h.s8.bf16 %v207_v51 }
  0xc4   :  { %934 = vmatpush1.bf16.msra.mxu0 %v500_v15  ;;  %1098 = vmatpush1.bf16.msra.mxu1 %v502_v16  ;;  %v556_v0 = vunpack.c.h.s8.bf16 %v204_v56  ;;  %v558_v1 = vunpack.c.h.s8.bf16 %v206_v57  ;;  %v565_v2 = vunpack.c.l.s8.bf16 %v213_v62  ;;  %v567_v3 = vunpack.c.l.s8.bf16 %v215_v63  ;;  %v221_v15 = vld [vmem:[#allocation7 + $0x348] sm:$0xff]  ;;  %v223_v16 = vld [vmem:[#allocation7 + $0x358] sm:$0xff] }
  0xc5   :  { %965 = vmatprep.mubr.bf16.mxu0 %v1934_v25  ;;  %1129 = vmatprep.mubr.bf16.mxu1 %v1934_v25  ;;  %v564_v7 = vunpack.c.l.s8.bf16 %v212_v4  ;;  %v566_v8 = vunpack.c.l.s8.bf16 %v214_v5  ;;  %v573_v9 = vunpack.c.h.s8.bf16 %v213_v62  ;;  %v575_v10 = vunpack.c.h.s8.bf16 %v215_v63 }
  0xc6   :  { %935 = vmatprep.subr.bf16.mxu0 %v509_v21  ;;  %1099 = vmatprep.subr.bf16.mxu1 %v511_v22  ;;  %v572_v17 = vunpack.c.h.s8.bf16 %v212_v4  ;;  %v574_v18 = vunpack.c.h.s8.bf16 %v214_v5  ;;  %v581_v19 = vunpack.c.l.s8.bf16 %v221_v15  ;;  %v583_v20 = vunpack.c.l.s8.bf16 %v223_v16  ;;  %v220_v21 = vld [vmem:[#allocation7 + $0x340] sm:$0xff]  ;;  %v222_v22 = vld [vmem:[#allocation7 + $0x350] sm:$0xff]  ;;  %v253_v4 = vld [vmem:[#allocation7 + $0x448] sm:$0xff] }
  0xc7   :  { %v580_v23 = vunpack.c.l.s8.bf16 %v220_v21  ;;  %v582_v24 = vunpack.c.l.s8.bf16 %v222_v22  ;;  %v588_v32 = vunpack.c.h.s8.bf16 %v220_v21  ;;  %v590_v33 = vunpack.c.h.s8.bf16 %v222_v22  ;;  %v255_v5 = vld [vmem:[#allocation7 + $0x458] sm:$0xff] }
  0xc8   :  { %936 = vmatpush1.bf16.msra.mxu0 %v508_v28  ;;  %1100 = vmatpush1.bf16.msra.mxu1 %v510_v29  ;;  %v589_v28 = vunpack.c.h.s8.bf16 %v221_v15  ;;  %v591_v29 = vunpack.c.h.s8.bf16 %v223_v16  ;;  %v1944_v63 = vpack.c.bf16 %v1918_v6, %v1918_v6 }
  0xc9   :  { %937 = vmatprep.subr.bf16.mxu0 %v517_v30  ;;  %1101 = vmatprep.subr.bf16.mxu1 %v519_v31  ;;  %v229_v30 = vld [vmem:[#allocation7 + $0x388] sm:$0xff]  ;;  %v231_v31 = vld [vmem:[#allocation7 + $0x398] sm:$0xff] }
  0xcc   :  { %938 = vmatpush1.bf16.msra.mxu0 %v516_v34  ;;  %1102 = vmatpush1.bf16.msra.mxu1 %v518_v35  ;;  %v597_v34 = vunpack.c.l.s8.bf16 %v229_v30  ;;  %v599_v35 = vunpack.c.l.s8.bf16 %v231_v31 }
  0xcd   :  { %939 = vmatprep.subr.bf16.mxu0 %v525_v36  ;;  %1103 = vmatprep.subr.bf16.mxu1 %v527_v37  ;;  %v228_v36 = vld [vmem:[#allocation7 + $0x380] sm:$0xff]  ;;  %v230_v37 = vld [vmem:[#allocation7 + $0x390] sm:$0xff] }
  0xce   :  { %v596_v38 = vunpack.c.l.s8.bf16 %v228_v36  ;;  %v598_v39 = vunpack.c.l.s8.bf16 %v230_v37  ;;  %v604_v44 = vunpack.c.h.s8.bf16 %v228_v36  ;;  %v606_v45 = vunpack.c.h.s8.bf16 %v230_v37 }
  0xd0   :  { %940 = vmatpush1.bf16.msra.mxu0 %v524_v40  ;;  %1104 = vmatpush1.bf16.msra.mxu1 %v526_v41  ;;  %v605_v40 = vunpack.c.h.s8.bf16 %v229_v30  ;;  %v607_v41 = vunpack.c.h.s8.bf16 %v231_v31 }
  0xd1   :  { %941 = vmatprep.subr.bf16.mxu0 %v533_v42  ;;  %1105 = vmatprep.subr.bf16.mxu1 %v535_v43  ;;  %v237_v42 = vld [vmem:[#allocation7 + $0x3c8] sm:$0xff]  ;;  %v239_v43 = vld [vmem:[#allocation7 + $0x3d8] sm:$0xff] }
  0xd4   :  { %942 = vmatpush1.bf16.msra.mxu0 %v532_v46  ;;  %1106 = vmatpush1.bf16.msra.mxu1 %v534_v47  ;;  %v613_v46 = vunpack.c.l.s8.bf16 %v237_v42  ;;  %v615_v47 = vunpack.c.l.s8.bf16 %v239_v43 }
  0xd5   :  { %943 = vmatprep.subr.bf16.mxu0 %v541_v48  ;;  %1107 = vmatprep.subr.bf16.mxu1 %v543_v49  ;;  %v236_v48 = vld [vmem:[#allocation7 + $0x3c0] sm:$0xff]  ;;  %v238_v49 = vld [vmem:[#allocation7 + $0x3d0] sm:$0xff] }
  0xd6   :  { %v612_v50 = vunpack.c.l.s8.bf16 %v236_v48  ;;  %v614_v51 = vunpack.c.l.s8.bf16 %v238_v49  ;;  %v620_v56 = vunpack.c.h.s8.bf16 %v236_v48  ;;  %v622_v57 = vunpack.c.h.s8.bf16 %v238_v49 }
  0xd8   :  { %944 = vmatpush1.bf16.msra.mxu0 %v540_v52  ;;  %1108 = vmatpush1.bf16.msra.mxu1 %v542_v53  ;;  %v621_v52 = vunpack.c.h.s8.bf16 %v237_v42  ;;  %v623_v53 = vunpack.c.h.s8.bf16 %v239_v43 }
  0xd9   :  { %945 = vmatprep.subr.bf16.mxu0 %v549_v54  ;;  %1109 = vmatprep.subr.bf16.mxu1 %v551_v55  ;;  %v245_v54 = vld [vmem:[#allocation7 + $0x408] sm:$0xff]  ;;  %v247_v55 = vld [vmem:[#allocation7 + $0x418] sm:$0xff] }
  0xdc   :  { %946 = vmatpush1.bf16.msra.mxu0 %v548_v58  ;;  %1110 = vmatpush1.bf16.msra.mxu1 %v550_v59  ;;  %v629_v58 = vunpack.c.l.s8.bf16 %v245_v54  ;;  %v631_v59 = vunpack.c.l.s8.bf16 %v247_v55 }
  0xdd   :  { %947 = vmatprep.subr.bf16.mxu0 %v557_v60  ;;  %1111 = vmatprep.subr.bf16.mxu1 %v559_v61  ;;  %v244_v60 = vld [vmem:[#allocation7 + $0x400] sm:$0xff]  ;;  %v246_v61 = vld [vmem:[#allocation7 + $0x410] sm:$0xff] }
  0xde   :  { %v628_v62 = vunpack.c.l.s8.bf16 %v244_v60  ;;  %v636_v6 = vunpack.c.h.s8.bf16 %v244_v60 }
  0xe0   :  { %948 = vmatpush1.bf16.msra.mxu0 %v556_v0  ;;  %1112 = vmatpush1.bf16.msra.mxu1 %v558_v1  ;;  %v630_v0 = vunpack.c.l.s8.bf16 %v246_v61  ;;  %v1948_v1 = vpack.c.bf16 %v1920_v11, %v1920_v11  ;;  %v647_v11 = vunpack.c.l.s8.bf16 %v255_v5 }
  0xe1   :  { %949 = vmatprep.subr.bf16.mxu0 %v565_v2  ;;  %1113 = vmatprep.subr.bf16.mxu1 %v567_v3  ;;  %v637_v2 = vunpack.c.h.s8.bf16 %v245_v54  ;;  %v639_v3 = vunpack.c.h.s8.bf16 %v247_v55 }
  0xe4   :  { %950 = vmatpush1.bf16.msra.mxu0 %v564_v7  ;;  %1114 = vmatpush1.bf16.msra.mxu1 %v566_v8  ;;  %v638_v7 = vunpack.c.h.s8.bf16 %v246_v61  ;;  %v645_v8 = vunpack.c.l.s8.bf16 %v253_v4 }
  0xe5   :  { %951 = vmatprep.subr.bf16.mxu0 %v573_v9  ;;  %1115 = vmatprep.subr.bf16.mxu1 %v575_v10  ;;  %v252_v9 = vld [vmem:[#allocation7 + $0x440] sm:$0xff]  ;;  %v254_v10 = vld [vmem:[#allocation7 + $0x450] sm:$0xff] }
  0xe6   :  { %v644_v15 = vunpack.c.l.s8.bf16 %v252_v9  ;;  %v646_v16 = vunpack.c.l.s8.bf16 %v254_v10  ;;  %v652_v21 = vunpack.c.h.s8.bf16 %v252_v9  ;;  %v654_v22 = vunpack.c.h.s8.bf16 %v254_v10  ;;  %v295_v9 = vld [vmem:[#allocation7 + $0x598] sm:$0xff] }
  0xe8   :  { %952 = vmatpush1.bf16.msra.mxu0 %v572_v17  ;;  %1116 = vmatpush1.bf16.msra.mxu1 %v574_v18  ;;  %v653_v17 = vunpack.c.h.s8.bf16 %v253_v4  ;;  %v655_v18 = vunpack.c.h.s8.bf16 %v255_v5 }
  0xe9   :  { %953 = vmatprep.subr.bf16.mxu0 %v581_v19  ;;  %1117 = vmatprep.subr.bf16.mxu1 %v583_v20  ;;  %v261_v19 = vld [vmem:[#allocation7 + $0x488] sm:$0xff]  ;;  %v263_v20 = vld [vmem:[#allocation7 + $0x498] sm:$0xff] }
  0xec   :  { %954 = vmatpush1.bf16.msra.mxu0 %v580_v23  ;;  %1118 = vmatpush1.bf16.msra.mxu1 %v582_v24  ;;  %v661_v23 = vunpack.c.l.s8.bf16 %v261_v19  ;;  %v260_v24 = vld [vmem:[#allocation7 + $0x480] sm:$0xff] }
  0xed   :  { %955 = vmatprep.subr.bf16.mxu0 %v589_v28  ;;  %1119 = vmatprep.subr.bf16.mxu1 %v591_v29  ;;  %v663_v28 = vunpack.c.l.s8.bf16 %v263_v20  ;;  %v262_v29 = vld [vmem:[#allocation7 + $0x490] sm:$0xff]  ;;  %v660_v30 = vunpack.c.l.s8.bf16 %v260_v24  ;;  %v668_v36 = vunpack.c.h.s8.bf16 %v260_v24  ;;  %v303_v24 = vld [vmem:[#allocation7 + $0x5d8] sm:$0xff] }
  0xee   :  { %v662_v31 = vunpack.c.l.s8.bf16 %v262_v29  ;;  %v670_v37 = vunpack.c.h.s8.bf16 %v262_v29 }
  0xf0   :  { %956 = vmatpush1.bf16.msra.mxu0 %v588_v32  ;;  %1120 = vmatpush1.bf16.msra.mxu1 %v590_v33  ;;  %v669_v32 = vunpack.c.h.s8.bf16 %v261_v19  ;;  %v671_v33 = vunpack.c.h.s8.bf16 %v263_v20 }
  0xf1   :  { %957 = vmatprep.subr.bf16.mxu0 %v597_v34  ;;  %1121 = vmatprep.subr.bf16.mxu1 %v599_v35  ;;  %v269_v34 = vld [vmem:[#allocation7 + $0x4c8] sm:$0xff]  ;;  %v271_v35 = vld [vmem:[#allocation7 + $0x4d8] sm:$0xff] }
  0xf4   :  { %958 = vmatpush1.bf16.msra.mxu0 %v596_v38  ;;  %1122 = vmatpush1.bf16.msra.mxu1 %v598_v39  ;;  %v677_v38 = vunpack.c.l.s8.bf16 %v269_v34  ;;  %v268_v39 = vld [vmem:[#allocation7 + $0x4c0] sm:$0xff] }
  0xf5   :  { %959 = vmatprep.subr.bf16.mxu0 %v605_v40  ;;  %1123 = vmatprep.subr.bf16.mxu1 %v607_v41  ;;  %v679_v40 = vunpack.c.l.s8.bf16 %v271_v35  ;;  %v270_v41 = vld [vmem:[#allocation7 + $0x4d0] sm:$0xff]  ;;  %v676_v42 = vunpack.c.l.s8.bf16 %v268_v39  ;;  %v684_v48 = vunpack.c.h.s8.bf16 %v268_v39  ;;  %v311_v39 = vld [vmem:[#allocation7 + $0x618] sm:$0xff] }
  0xf6   :  { %v678_v43 = vunpack.c.l.s8.bf16 %v270_v41  ;;  %v686_v49 = vunpack.c.h.s8.bf16 %v270_v41 }
  0xf8   :  { %960 = vmatpush1.bf16.msra.mxu0 %v604_v44  ;;  %1124 = vmatpush1.bf16.msra.mxu1 %v606_v45  ;;  %v685_v44 = vunpack.c.h.s8.bf16 %v269_v34  ;;  %v687_v45 = vunpack.c.h.s8.bf16 %v271_v35 }
  0xf9   :  { %961 = vmatprep.subr.bf16.mxu0 %v613_v46  ;;  %1125 = vmatprep.subr.bf16.mxu1 %v615_v47  ;;  %v277_v46 = vld [vmem:[#allocation7 + $0x508] sm:$0xff]  ;;  %v279_v47 = vld [vmem:[#allocation7 + $0x518] sm:$0xff] }
  0xfc   :  { %962 = vmatpush1.bf16.msra.mxu0 %v612_v50  ;;  %1126 = vmatpush1.bf16.msra.mxu1 %v614_v51  ;;  %v693_v50 = vunpack.c.l.s8.bf16 %v277_v46  ;;  %v276_v51 = vld [vmem:[#allocation7 + $0x500] sm:$0xff] }
  0xfd   :  { %963 = vmatprep.subr.bf16.mxu0 %v621_v52  ;;  %1127 = vmatprep.subr.bf16.mxu1 %v623_v53  ;;  %v695_v52 = vunpack.c.l.s8.bf16 %v279_v47  ;;  %v278_v53 = vld [vmem:[#allocation7 + $0x510] sm:$0xff]  ;;  %v692_v54 = vunpack.c.l.s8.bf16 %v276_v51  ;;  %v700_v60 = vunpack.c.h.s8.bf16 %v276_v51  ;;  %v1961_v51 = vpack.c.bf16 %v1936_v26, %v1936_v26 }
  0xfe   :  { %v694_v55 = vunpack.c.l.s8.bf16 %v278_v53  ;;  %v702_v61 = vunpack.c.h.s8.bf16 %v278_v53  ;;  %v319_v53 = vld [vmem:[#allocation7 + $0x658] sm:$0xff] }
 0x100   :  { %964 = vmatpush1.bf16.msra.mxu0 %v620_v56  ;;  %1128 = vmatpush1.bf16.msra.mxu1 %v622_v57  ;;  %v701_v56 = vunpack.c.h.s8.bf16 %v277_v46  ;;  %v703_v57 = vunpack.c.h.s8.bf16 %v279_v47  ;;  %v1956_v47 = vpack.c.bf16 %v1922_v12, %v1922_v12 }
 0x101   :  { %974 = vmatprep.subr.bf16.mxu0 %v629_v58  ;;  %1138 = vmatprep.subr.bf16.mxu1 %v631_v59  ;;  %v285_v58 = vld [vmem:[#allocation7 + $0x548] sm:$0xff]  ;;  %v287_v59 = vld [vmem:[#allocation7 + $0x558] sm:$0xff] }
 0x103   :  { %966 = vmatmul.mubr.bf16.vlgmr.msra.gmra.mrb[0].mxu0 %v1944_v63  ;;  %1130 = vmatmul.mubr.bf16.vlgmr.msra.gmra.mrb[0].mxu1 %v1944_v63 }
 0x104   :  { %975 = vmatpush1.bf16.msra.mxu0 %v628_v62  ;;  %1006 = vmatprep.mubr.bf16.mxu0 %v1948_v1  ;;  %v709_v62 = vunpack.c.l.s8.bf16 %v285_v58 }
 0x105   :  { %1139 = vmatpush1.bf16.msra.mxu1 %v630_v0  ;;  %1170 = vmatprep.mubr.bf16.mxu1 %v1948_v1  ;;  %v284_v0 = vld [vmem:[#allocation7 + $0x540] sm:$0xff] }
 0x106   :  { %976 = vmatprep.subr.bf16.mxu0 %v637_v2  ;;  %1140 = vmatprep.subr.bf16.mxu1 %v639_v3  ;;  %v711_v2 = vunpack.c.l.s8.bf16 %v287_v59  ;;  %v286_v3 = vld [vmem:[#allocation7 + $0x550] sm:$0xff]  ;;  %v708_v4 = vunpack.c.l.s8.bf16 %v284_v0 }
 0x107   :  { %v710_v5 = vunpack.c.l.s8.bf16 %v286_v3  ;;  %v718_v10 = vunpack.c.h.s8.bf16 %v286_v3 }
 0x108   :  { %977 = vmatpush1.bf16.msra.mxu0 %v636_v6  ;;  %v717_v6 = vunpack.c.h.s8.bf16 %v285_v58  ;;  %v318_v58 = vld [vmem:[#allocation7 + $0x650] sm:$0xff] }
 0x109   :  { %1141 = vmatpush1.bf16.msra.mxu1 %v638_v7  ;;  %978 = vmatprep.subr.bf16.mxu0 %v645_v8  ;;  %v719_v7 = vunpack.c.h.s8.bf16 %v287_v59  ;;  %v293_v8 = vld [vmem:[#allocation7 + $0x588] sm:$0xff]  ;;  %v774_v59 = vunpack.c.l.s8.bf16 %v318_v58  ;;  %v782_v3 = vunpack.c.h.s8.bf16 %v318_v58 }
 0x10a   :  { %1142 = vmatprep.subr.bf16.mxu1 %v647_v11  ;;  %v716_v11 = vunpack.c.h.s8.bf16 %v284_v0  ;;  %v327_v0 = vld [vmem:[#allocation7 + $0x698] sm:$0xff] }
 0x10c   :  { %979 = vmatpush1.bf16.msra.mxu0 %v644_v15  ;;  %v725_v15 = vunpack.c.l.s8.bf16 %v293_v8 }
 0x10d   :  { %1143 = vmatpush1.bf16.msra.mxu1 %v646_v16  ;;  %980 = vmatprep.subr.bf16.mxu0 %v653_v17  ;;  %v292_v16 = vld [vmem:[#allocation7 + $0x580] sm:$0xff]  ;;  %v727_v17 = vunpack.c.l.s8.bf16 %v295_v9 }
 0x10e   :  { %1144 = vmatprep.subr.bf16.mxu1 %v655_v18  ;;  %v294_v18 = vld [vmem:[#allocation7 + $0x590] sm:$0xff]  ;;  %v724_v19 = vunpack.c.l.s8.bf16 %v292_v16 }
 0x10f   :  { %v726_v20 = vunpack.c.l.s8.bf16 %v294_v18  ;;  %v734_v29 = vunpack.c.h.s8.bf16 %v294_v18 }
 0x110   :  { %981 = vmatpush1.bf16.msra.mxu0 %v652_v21  ;;  %v733_v21 = vunpack.c.h.s8.bf16 %v293_v8 }
 0x111   :  { %1145 = vmatpush1.bf16.msra.mxu1 %v654_v22  ;;  %982 = vmatprep.subr.bf16.mxu0 %v661_v23  ;;  %v735_v22 = vunpack.c.h.s8.bf16 %v295_v9  ;;  %v301_v23 = vld [vmem:[#allocation7 + $0x5c8] sm:$0xff] }
 0x112   :  { %1146 = vmatprep.subr.bf16.mxu1 %v663_v28  ;;  %v732_v28 = vunpack.c.h.s8.bf16 %v292_v16  ;;  %v335_v16 = vld [vmem:[#allocation7 + $0x6d8] sm:$0xff] }
 0x114   :  { %983 = vmatpush1.bf16.msra.mxu0 %v660_v30  ;;  %v741_v30 = vunpack.c.l.s8.bf16 %v301_v23 }
 0x115   :  { %1147 = vmatpush1.bf16.msra.mxu1 %v662_v31  ;;  %984 = vmatprep.subr.bf16.mxu0 %v669_v32  ;;  %v300_v31 = vld [vmem:[#allocation7 + $0x5c0] sm:$0xff]  ;;  %v743_v32 = vunpack.c.l.s8.bf16 %v303_v24 }
 0x116   :  { %1148 = vmatprep.subr.bf16.mxu1 %v671_v33  ;;  %v302_v33 = vld [vmem:[#allocation7 + $0x5d0] sm:$0xff]  ;;  %v740_v34 = vunpack.c.l.s8.bf16 %v300_v31 }
 0x117   :  { %v742_v35 = vunpack.c.l.s8.bf16 %v302_v33  ;;  %v750_v41 = vunpack.c.h.s8.bf16 %v302_v33 }
 0x118   :  { %985 = vmatpush1.bf16.msra.mxu0 %v668_v36  ;;  %v749_v36 = vunpack.c.h.s8.bf16 %v301_v23 }
 0x119   :  { %1149 = vmatpush1.bf16.msra.mxu1 %v670_v37  ;;  %986 = vmatprep.subr.bf16.mxu0 %v677_v38  ;;  %v751_v37 = vunpack.c.h.s8.bf16 %v303_v24  ;;  %v309_v38 = vld [vmem:[#allocation7 + $0x608] sm:$0xff] }
 0x11a   :  { %1150 = vmatprep.subr.bf16.mxu1 %v679_v40  ;;  %v748_v40 = vunpack.c.h.s8.bf16 %v300_v31  ;;  %v343_v31 = vld [vmem:[#allocation7 + $0x718] sm:$0xff] }
 0x11c   :  { %987 = vmatpush1.bf16.msra.mxu0 %v676_v42  ;;  %v757_v42 = vunpack.c.l.s8.bf16 %v309_v38 }
 0x11d   :  { %1151 = vmatpush1.bf16.msra.mxu1 %v678_v43  ;;  %988 = vmatprep.subr.bf16.mxu0 %v685_v44  ;;  %v308_v43 = vld [vmem:[#allocation7 + $0x600] sm:$0xff]  ;;  %v759_v44 = vunpack.c.l.s8.bf16 %v311_v39 }
 0x11e   :  { %1152 = vmatprep.subr.bf16.mxu1 %v687_v45  ;;  %v310_v45 = vld [vmem:[#allocation7 + $0x610] sm:$0xff]  ;;  %v756_v46 = vunpack.c.l.s8.bf16 %v308_v43 }
 0x11f   :  { %v766_v12 = vunpack.c.h.s8.bf16 %v310_v45 }
 0x120   :  { %989 = vmatpush1.bf16.msra.mxu0 %v684_v48  ;;  %v758_v48 = vunpack.c.l.s8.bf16 %v310_v45 }
 0x121   :  { %1153 = vmatpush1.bf16.msra.mxu1 %v686_v49  ;;  %990 = vmatprep.subr.bf16.mxu0 %v693_v50  ;;  %v765_v49 = vunpack.c.h.s8.bf16 %v309_v38  ;;  %v317_v50 = vld [vmem:[#allocation7 + $0x648] sm:$0xff] }
 0x122   :  { %1154 = vmatprep.subr.bf16.mxu1 %v695_v52  ;;  %v767_v52 = vunpack.c.h.s8.bf16 %v311_v39 }
 0x124   :  { %991 = vmatpush1.bf16.msra.mxu0 %v692_v54  ;;  %v764_v54 = vunpack.c.h.s8.bf16 %v308_v43  ;;  %v351_v43 = vld [vmem:[#allocation7 + $0x758] sm:$0xff] }
 0x125   :  { %1155 = vmatpush1.bf16.msra.mxu1 %v694_v55  ;;  %992 = vmatprep.subr.bf16.mxu0 %v701_v56  ;;  %v773_v55 = vunpack.c.l.s8.bf16 %v317_v50  ;;  %v316_v56 = vld [vmem:[#allocation7 + $0x640] sm:$0xff] }
 0x126   :  { %1156 = vmatprep.subr.bf16.mxu1 %v703_v57  ;;  %v775_v57 = vunpack.c.l.s8.bf16 %v319_v53  ;;  %v772_v26 = vunpack.c.l.s8.bf16 %v316_v56 }
 0x128   :  { %993 = vmatpush1.bf16.msra.mxu0 %v700_v60  ;;  %v781_v60 = vunpack.c.h.s8.bf16 %v317_v50  ;;  %v350_v50 = vld [vmem:[#allocation7 + $0x750] sm:$0xff] }
 0x129   :  { %1157 = vmatpush1.bf16.msra.mxu1 %v702_v61  ;;  %994 = vmatprep.subr.bf16.mxu0 %v709_v62  ;;  %v783_v61 = vunpack.c.h.s8.bf16 %v319_v53  ;;  %v325_v62 = vld [vmem:[#allocation7 + $0x688] sm:$0xff]  ;;  %v838_v53 = vunpack.c.l.s8.bf16 %v350_v50  ;;  %v846_v58 = vunpack.c.h.s8.bf16 %v350_v50 }
 0x12a   :  { %1158 = vmatprep.subr.bf16.mxu1 %v711_v2  ;;  %v780_v2 = vunpack.c.h.s8.bf16 %v316_v56  ;;  %v359_v56 = vld [vmem:[#allocation7 + $0x798] sm:$0xff] }
 0x12c   :  { %995 = vmatpush1.bf16.msra.mxu0 %v708_v4  ;;  %v789_v4 = vunpack.c.l.s8.bf16 %v325_v62 }
 0x12d   :  { %1159 = vmatpush1.bf16.msra.mxu1 %v710_v5  ;;  %996 = vmatprep.subr.bf16.mxu0 %v717_v6  ;;  %v324_v5 = vld [vmem:[#allocation7 + $0x680] sm:$0xff]  ;;  %v791_v6 = vunpack.c.l.s8.bf16 %v327_v0 }
 0x12e   :  { %1160 = vmatprep.subr.bf16.mxu1 %v719_v7  ;;  %v326_v7 = vld [vmem:[#allocation7 + $0x690] sm:$0xff]  ;;  %v788_v8 = vunpack.c.l.s8.bf16 %v324_v5 }
 0x12f   :  { %v790_v9 = vunpack.c.l.s8.bf16 %v326_v7  ;;  %v798_v18 = vunpack.c.h.s8.bf16 %v326_v7 }
 0x130   :  { %997 = vmatpush1.bf16.msra.mxu0 %v716_v11  ;;  %v797_v11 = vunpack.c.h.s8.bf16 %v325_v62 }
 0x131   :  { %1161 = vmatpush1.bf16.msra.mxu1 %v718_v10  ;;  %998 = vmatprep.subr.bf16.mxu0 %v725_v15  ;;  %v799_v10 = vunpack.c.h.s8.bf16 %v327_v0  ;;  %v333_v15 = vld [vmem:[#allocation7 + $0x6c8] sm:$0xff] }
 0x132   :  { %1162 = vmatprep.subr.bf16.mxu1 %v727_v17  ;;  %v796_v17 = vunpack.c.h.s8.bf16 %v324_v5  ;;  %v367_v5 = vld [vmem:[#allocation7 + $0x7d8] sm:$0xff] }
 0x134   :  { %999 = vmatpush1.bf16.msra.mxu0 %v724_v19  ;;  %v805_v19 = vunpack.c.l.s8.bf16 %v333_v15 }
 0x135   :  { %1163 = vmatpush1.bf16.msra.mxu1 %v726_v20  ;;  %1000 = vmatprep.subr.bf16.mxu0 %v733_v21  ;;  %v332_v20 = vld [vmem:[#allocation7 + $0x6c0] sm:$0xff]  ;;  %v807_v21 = vunpack.c.l.s8.bf16 %v335_v16 }
 0x136   :  { %1164 = vmatprep.subr.bf16.mxu1 %v735_v22  ;;  %v334_v22 = vld [vmem:[#allocation7 + $0x6d0] sm:$0xff]  ;;  %v804_v23 = vunpack.c.l.s8.bf16 %v332_v20 }
 0x137   :  { %v806_v24 = vunpack.c.l.s8.bf16 %v334_v22  ;;  %v814_v33 = vunpack.c.h.s8.bf16 %v334_v22 }
 0x138   :  { %1001 = vmatpush1.bf16.msra.mxu0 %v732_v28  ;;  %v813_v28 = vunpack.c.h.s8.bf16 %v333_v15 }
 0x139   :  { %1165 = vmatpush1.bf16.msra.mxu1 %v734_v29  ;;  %1002 = vmatprep.subr.bf16.mxu0 %v741_v30  ;;  %v815_v29 = vunpack.c.h.s8.bf16 %v335_v16  ;;  %v341_v30 = vld [vmem:[#allocation7 + $0x708] sm:$0xff] }
 0x13a   :  { %1166 = vmatprep.subr.bf16.mxu1 %v743_v32  ;;  %v812_v32 = vunpack.c.h.s8.bf16 %v332_v20  ;;  %v123_v20 = vld [vmem:[#allocation7 + $0x38] sm:$0xff] }
 0x13c   :  { %1003 = vmatpush1.bf16.msra.mxu0 %v740_v34  ;;  %v821_v34 = vunpack.c.l.s8.bf16 %v341_v30 }
 0x13d   :  { %1167 = vmatpush1.bf16.msra.mxu1 %v742_v35  ;;  %1004 = vmatprep.subr.bf16.mxu0 %v749_v36  ;;  %v340_v35 = vld [vmem:[#allocation7 + $0x700] sm:$0xff]  ;;  %v823_v36 = vunpack.c.l.s8.bf16 %v343_v31 }
 0x13e   :  { %1168 = vmatprep.subr.bf16.mxu1 %v751_v37  ;;  %v342_v37 = vld [vmem:[#allocation7 + $0x710] sm:$0xff]  ;;  %v820_v38 = vunpack.c.l.s8.bf16 %v340_v35 }
 0x13f   :  { %v822_v39 = vunpack.c.l.s8.bf16 %v342_v37  ;;  %v830_v45 = vunpack.c.h.s8.bf16 %v342_v37 }
 0x140   :  { %1005 = vmatpush1.bf16.msra.mxu0 %v748_v40  ;;  %v829_v40 = vunpack.c.h.s8.bf16 %v341_v30 }
 0x141   :  { %1169 = vmatpush1.bf16.msra.mxu1 %v750_v41  ;;  %1015 = vmatprep.subr.bf16.mxu0 %v757_v42  ;;  %v831_v41 = vunpack.c.h.s8.bf16 %v343_v31  ;;  %v349_v42 = vld [vmem:[#allocation7 + $0x748] sm:$0xff]  ;;  %v1968_v31 = vpack.c.bf16 %v1938_v27, %v1938_v27  ;;  %v128_v27 = vld [vmem:[#allocation7 + $0x60] sm:$0xff] }
 0x142   :  { %1179 = vmatprep.subr.bf16.mxu1 %v759_v44  ;;  %v828_v44 = vunpack.c.h.s8.bf16 %v340_v35  ;;  %v387_v35 = vunpack.c.h.s8.bf16 %v123_v20 }
 0x143   :  { %1007 = vmatmul.mubr.bf16.vlgmr.msra.gmra.mrb[0].mxu0 %v1956_v47 }
 0x144   :  { %1171 = vmatmul.mubr.bf16.vlgmr.msra.gmra.mrb[0].mxu1 %v1956_v47  ;;  %1016 = vmatpush1.bf16.msra.mxu0 %v756_v46  ;;  %v837_v46 = vunpack.c.l.s8.bf16 %v349_v42 }
 0x145   :  { %1047 = vmatprep.mubr.bf16.mxu0 %v1961_v51  ;;  %1180 = vmatpush1.bf16.msra.mxu1 %v758_v48  ;;  %v348_v48 = vld [vmem:[#allocation7 + $0x740] sm:$0xff] }
 0x146   :  { %1211 = vmatprep.mubr.bf16.mxu1 %v1961_v51  ;;  %1017 = vmatprep.subr.bf16.mxu0 %v765_v49  ;;  %v839_v49 = vunpack.c.l.s8.bf16 %v351_v43 }
 0x147   :  { %1181 = vmatprep.subr.bf16.mxu1 %v767_v52  ;;  %v836_v52 = vunpack.c.l.s8.bf16 %v348_v48 }
 0x148   :  { %1018 = vmatpush1.bf16.msra.mxu0 %v764_v54  ;;  %v845_v54 = vunpack.c.h.s8.bf16 %v349_v42  ;;  %v392_v42 = vunpack.c.l.s8.bf16 %v128_v27 }
 0x149   :  { %1182 = vmatpush1.bf16.msra.mxu1 %v766_v12  ;;  %1019 = vmatprep.subr.bf16.mxu0 %v773_v55  ;;  %v847_v12 = vunpack.c.h.s8.bf16 %v351_v43  ;;  %v357_v55 = vld [vmem:[#allocation7 + $0x788] sm:$0xff] }
 0x14a   :  { %1183 = vmatprep.subr.bf16.mxu1 %v775_v57  ;;  %v844_v57 = vunpack.c.h.s8.bf16 %v348_v48  ;;  %v139_v48 = vld [vmem:[#allocation7 + $0xb8] sm:$0xff] }
 0x14c   :  { %1020 = vmatpush1.bf16.msra.mxu0 %v772_v26  ;;  %v853_v26 = vunpack.c.l.s8.bf16 %v357_v55 }
 0x14d   :  { %1184 = vmatpush1.bf16.msra.mxu1 %v774_v59  ;;  %1021 = vmatprep.subr.bf16.mxu0 %v781_v60  ;;  %v356_v59 = vld [vmem:[#allocation7 + $0x780] sm:$0xff]  ;;  %v855_v60 = vunpack.c.l.s8.bf16 %v359_v56 }
 0x14e   :  { %1185 = vmatprep.subr.bf16.mxu1 %v783_v61  ;;  %v358_v61 = vld [vmem:[#allocation7 + $0x790] sm:$0xff]  ;;  %v852_v62 = vunpack.c.l.s8.bf16 %v356_v59 }
 0x14f   :  { %v854_v0 = vunpack.c.l.s8.bf16 %v358_v61  ;;  %v862_v7 = vunpack.c.h.s8.bf16 %v358_v61 }
 0x150   :  { %1022 = vmatpush1.bf16.msra.mxu0 %v780_v2  ;;  %v861_v2 = vunpack.c.h.s8.bf16 %v357_v55 }
 0x151   :  { %1186 = vmatpush1.bf16.msra.mxu1 %v782_v3  ;;  %1023 = vmatprep.subr.bf16.mxu0 %v789_v4  ;;  %v863_v3 = vunpack.c.h.s8.bf16 %v359_v56  ;;  %v365_v4 = vld [vmem:[#allocation7 + $0x7c8] sm:$0xff] }
 0x152   :  { %1187 = vmatprep.subr.bf16.mxu1 %v791_v6  ;;  %v860_v6 = vunpack.c.h.s8.bf16 %v356_v59 }
 0x154   :  { %1024 = vmatpush1.bf16.msra.mxu0 %v788_v8  ;;  %v869_v8 = vunpack.c.l.s8.bf16 %v365_v4 }
 0x155   :  { %1188 = vmatpush1.bf16.msra.mxu1 %v790_v9  ;;  %1025 = vmatprep.subr.bf16.mxu0 %v797_v11  ;;  %v364_v9 = vld [vmem:[#allocation7 + $0x7c0] sm:$0xff]  ;;  %v871_v11 = vunpack.c.l.s8.bf16 %v367_v5 }
 0x156   :  { %1189 = vmatprep.subr.bf16.mxu1 %v799_v10  ;;  %v366_v10 = vld [vmem:[#allocation7 + $0x7d0] sm:$0xff]  ;;  %v868_v15 = vunpack.c.l.s8.bf16 %v364_v9 }
 0x157   :  { %v870_v16 = vunpack.c.l.s8.bf16 %v366_v10  ;;  %v878_v22 = vunpack.c.h.s8.bf16 %v366_v10 }
 0x158   :  { %1026 = vmatpush1.bf16.msra.mxu0 %v796_v17  ;;  %v877_v17 = vunpack.c.h.s8.bf16 %v365_v4 }
 0x159   :  { %1190 = vmatpush1.bf16.msra.mxu1 %v798_v18  ;;  %1027 = vmatprep.subr.bf16.mxu0 %v805_v19  ;;  %v879_v18 = vunpack.c.h.s8.bf16 %v367_v5  ;;  %v121_v19 = vld [vmem:[#allocation7 + $0x28] sm:$0xff] }
 0x15a   :  { %1191 = vmatprep.subr.bf16.mxu1 %v807_v21  ;;  %v876_v21 = vunpack.c.h.s8.bf16 %v364_v9 }
 0x15c   :  { %1028 = vmatpush1.bf16.msra.mxu0 %v804_v23  ;;  %v377_v23 = vunpack.c.l.s8.bf16 %v121_v19 }
 0x15d   :  { %1192 = vmatpush1.bf16.msra.mxu1 %v806_v24  ;;  %1029 = vmatprep.subr.bf16.mxu0 %v813_v28  ;;  %v120_v24 = vld [vmem:[#allocation7 + $0x20] sm:$0xff]  ;;  %v379_v28 = vunpack.c.l.s8.bf16 %v123_v20 }
 0x15e   :  { %1193 = vmatprep.subr.bf16.mxu1 %v815_v29  ;;  %v122_v29 = vld [vmem:[#allocation7 + $0x30] sm:$0xff]  ;;  %v376_v30 = vunpack.c.l.s8.bf16 %v120_v24  ;;  %v384_v37 = vunpack.c.h.s8.bf16 %v120_v24 }
 0x160   :  { %1030 = vmatpush1.bf16.msra.mxu0 %v812_v32  ;;  %v378_v32 = vunpack.c.l.s8.bf16 %v122_v29 }
 0x161   :  { %1194 = vmatpush1.bf16.msra.mxu1 %v814_v33  ;;  %1031 = vmatprep.subr.bf16.mxu0 %v821_v34  ;;  %v385_v33 = vunpack.c.h.s8.bf16 %v121_v19  ;;  %v129_v34 = vld [vmem:[#allocation7 + $0x68] sm:$0xff] }
 0x162   :  { %1195 = vmatprep.subr.bf16.mxu1 %v823_v36  ;;  %v131_v36 = vld [vmem:[#allocation7 + $0x78] sm:$0xff] }
 0x164   :  { %1032 = vmatpush1.bf16.msra.mxu0 %v820_v38  ;;  %v386_v38 = vunpack.c.h.s8.bf16 %v122_v29 }
 0x165   :  { %1196 = vmatpush1.bf16.msra.mxu1 %v822_v39  ;;  %1033 = vmatprep.subr.bf16.mxu0 %v829_v40  ;;  %v393_v39 = vunpack.c.l.s8.bf16 %v129_v34  ;;  %v395_v40 = vunpack.c.l.s8.bf16 %v131_v36 }
 0x166   :  { %1197 = vmatprep.subr.bf16.mxu1 %v831_v41  ;;  %v130_v41 = vld [vmem:[#allocation7 + $0x70] sm:$0xff] }
 0x167   :  { %v394_v43 = vunpack.c.l.s8.bf16 %v130_v41  ;;  %v402_v50 = vunpack.c.h.s8.bf16 %v130_v41 }
 0x168   :  { %1034 = vmatpush1.bf16.msra.mxu0 %v828_v44  ;;  %v401_v44 = vunpack.c.h.s8.bf16 %v129_v34 }
 0x169   :  { %1198 = vmatpush1.bf16.msra.mxu1 %v830_v45  ;;  %1035 = vmatprep.subr.bf16.mxu0 %v837_v46  ;;  %v403_v45 = vunpack.c.h.s8.bf16 %v131_v36  ;;  %v137_v46 = vld [vmem:[#allocation7 + $0xa8] sm:$0xff] }
 0x16a   :  { %1199 = vmatprep.subr.bf16.mxu1 %v839_v49  ;;  %v400_v49 = vunpack.c.h.s8.bf16 %v128_v27  ;;  %v417_v56 = vunpack.c.h.s8.bf16 %v137_v46 }
 0x16c   :  { %1036 = vmatpush1.bf16.msra.mxu0 %v836_v52  ;;  %v136_v52 = vld [vmem:[#allocation7 + $0xa0] sm:$0xff] }
 0x16d   :  { %1200 = vmatpush1.bf16.msra.mxu1 %v838_v53  ;;  %1037 = vmatprep.subr.bf16.mxu0 %v845_v54  ;;  %v411_v53 = vunpack.c.l.s8.bf16 %v139_v48  ;;  %v138_v54 = vld [vmem:[#allocation7 + $0xb0] sm:$0xff]  ;;  %v416_v59 = vunpack.c.h.s8.bf16 %v136_v52 }
 0x16e   :  { %1201 = vmatprep.subr.bf16.mxu1 %v847_v12  ;;  %v408_v12 = vunpack.c.l.s8.bf16 %v136_v52  ;;  %v410_v55 = vunpack.c.l.s8.bf16 %v138_v54 }
 0x170   :  { %1038 = vmatpush1.bf16.msra.mxu0 %v844_v57  ;;  %v419_v57 = vunpack.c.h.s8.bf16 %v139_v48 }
 0x171   :  { %1202 = vmatpush1.bf16.msra.mxu1 %v846_v58  ;;  %1039 = vmatprep.subr.bf16.mxu0 %v853_v26  ;;  %v145_v58 = vld [vmem:[#allocation7 + $0xe8] sm:$0xff]  ;;  %v147_v26 = vld [vmem:[#allocation7 + $0xf8] sm:$0xff] }
 0x172   :  { %1203 = vmatprep.subr.bf16.mxu1 %v855_v60  ;;  %v418_v60 = vunpack.c.h.s8.bf16 %v138_v54  ;;  %v425_v61 = vunpack.c.l.s8.bf16 %v145_v58  ;;  %v433_v5 = vunpack.c.h.s8.bf16 %v145_v58 }
 0x174   :  { %1040 = vmatpush1.bf16.msra.mxu0 %v852_v62  ;;  %v144_v62 = vld [vmem:[#allocation7 + $0xe0] sm:$0xff] }
 0x175   :  { %1204 = vmatpush1.bf16.msra.mxu1 %v854_v0  ;;  %1041 = vmatprep.subr.bf16.mxu0 %v861_v2  ;;  %v427_v0 = vunpack.c.l.s8.bf16 %v147_v26  ;;  %v146_v2 = vld [vmem:[#allocation7 + $0xf0] sm:$0xff]  ;;  %v432_v9 = vunpack.c.h.s8.bf16 %v144_v62 }
 0x176   :  { %1205 = vmatprep.subr.bf16.mxu1 %v863_v3  ;;  %v424_v3 = vunpack.c.l.s8.bf16 %v144_v62  ;;  %v426_v4 = vunpack.c.l.s8.bf16 %v146_v2 }
 0x178   :  { %1042 = vmatpush1.bf16.msra.mxu0 %v860_v6  ;;  %v435_v6 = vunpack.c.h.s8.bf16 %v147_v26 }
 0x179   :  { %1206 = vmatpush1.bf16.msra.mxu1 %v862_v7  ;;  %1043 = vmatprep.subr.bf16.mxu0 %v869_v8  ;;  %v153_v7 = vld [vmem:[#allocation7 + $0x128] sm:$0xff]  ;;  %v155_v8 = vld [vmem:[#allocation7 + $0x138] sm:$0xff] }
 0x17a   :  { %1207 = vmatprep.subr.bf16.mxu1 %v871_v11  ;;  %v434_v11 = vunpack.c.h.s8.bf16 %v146_v2  ;;  %v441_v10 = vunpack.c.l.s8.bf16 %v153_v7  ;;  %v449_v20 = vunpack.c.h.s8.bf16 %v153_v7 }
 0x17c   :  { %1044 = vmatpush1.bf16.msra.mxu0 %v868_v15  ;;  %v152_v15 = vld [vmem:[#allocation7 + $0x120] sm:$0xff] }
 0x17d   :  { %1208 = vmatpush1.bf16.msra.mxu1 %v870_v16  ;;  %1045 = vmatprep.subr.bf16.mxu0 %v877_v17  ;;  %v443_v16 = vunpack.c.l.s8.bf16 %v155_v8  ;;  %v154_v17 = vld [vmem:[#allocation7 + $0x130] sm:$0xff]  ;;  %v448_v24 = vunpack.c.h.s8.bf16 %v152_v15 }
 0x17e   :  { %1209 = vmatprep.subr.bf16.mxu1 %v879_v18  ;;  %v440_v18 = vunpack.c.l.s8.bf16 %v152_v15  ;;  %v442_v19 = vunpack.c.l.s8.bf16 %v154_v17 }
 0x180   :  { %1046 = vmatpush1.bf16.msra.mxu0 %v876_v21  ;;  %v451_v21 = vunpack.c.h.s8.bf16 %v155_v8 }
 0x181   :  { %1210 = vmatpush1.bf16.msra.mxu1 %v878_v22  ;;  %1220 = vmatprep.subr.bf16.mxu0 %v377_v23  ;;  %v161_v22 = vld [vmem:[#allocation7 + $0x168] sm:$0xff]  ;;  %v163_v23 = vld [vmem:[#allocation7 + $0x178] sm:$0xff] }
 0x182   :  { %1384 = vmatprep.subr.bf16.mxu1 %v379_v28  ;;  %v450_v28 = vunpack.c.h.s8.bf16 %v154_v17  ;;  %v457_v29 = vunpack.c.l.s8.bf16 %v161_v22  ;;  %v465_v36 = vunpack.c.h.s8.bf16 %v161_v22 }
 0x183   :  { %1048 = vmatmul.mubr.bf16.vlgmr.msra.gmra.mrb[0].mxu0 %v1968_v31 }
 0x184   :  { %1212 = vmatmul.mubr.bf16.vlgmr.msra.gmra.mrb[0].mxu1 %v1968_v31  ;;  %1221 = vmatpush1.bf16.msra.mxu0 %v376_v30  ;;  %v160_v30 = vld [vmem:[#allocation7 + $0x160] sm:$0xff] }
 0x185   :  { %1252 = vmatprep.mubr.bf16.mxu0 %v1924_v13  ;;  %1385 = vmatpush1.bf16.msra.mxu1 %v378_v32  ;;  %v459_v32 = vunpack.c.l.s8.bf16 %v163_v23  ;;  %v456_v34 = vunpack.c.l.s8.bf16 %v160_v30  ;;  %v464_v27 = vunpack.c.h.s8.bf16 %v160_v30 }
 0x186   :  { %1416 = vmatprep.mubr.bf16.mxu1 %v1924_v13  ;;  %1222 = vmatprep.subr.bf16.mxu0 %v385_v33  ;;  %v409_v13 = vunpack.c.l.s8.bf16 %v137_v46  ;;  %v162_v33 = vld [vmem:[#allocation7 + $0x170] sm:$0xff] }
 0x187   :  { %1386 = vmatprep.subr.bf16.mxu1 %v387_v35  ;;  %v458_v35 = vunpack.c.l.s8.bf16 %v162_v33 }
 0x188   :  { %1223 = vmatpush1.bf16.msra.mxu0 %v384_v37  ;;  %v467_v37 = vunpack.c.h.s8.bf16 %v163_v23 }
 0x189   :  { %1387 = vmatpush1.bf16.msra.mxu1 %v386_v38  ;;  %1224 = vmatprep.subr.bf16.mxu0 %v393_v39  ;;  %v169_v38 = vld [vmem:[#allocation7 + $0x1a8] sm:$0xff]  ;;  %v171_v39 = vld [vmem:[#allocation7 + $0x1b8] sm:$0xff] }
 0x18a   :  { %1388 = vmatprep.subr.bf16.mxu1 %v395_v40  ;;  %v466_v40 = vunpack.c.h.s8.bf16 %v162_v33  ;;  %v473_v41 = vunpack.c.l.s8.bf16 %v169_v38  ;;  %v481_v48 = vunpack.c.h.s8.bf16 %v169_v38 }
 0x18c   :  { %1225 = vmatpush1.bf16.msra.mxu0 %v392_v42  ;;  %v168_v42 = vld [vmem:[#allocation7 + $0x1a0] sm:$0xff] }
 0x18d   :  { %1389 = vmatpush1.bf16.msra.mxu1 %v394_v43  ;;  %1226 = vmatprep.subr.bf16.mxu0 %v401_v44  ;;  %v475_v43 = vunpack.c.l.s8.bf16 %v171_v39  ;;  %v170_v44 = vld [vmem:[#allocation7 + $0x1b0] sm:$0xff]  ;;  %v480_v52 = vunpack.c.h.s8.bf16 %v168_v42 }
 0x18e   :  { %1390 = vmatprep.subr.bf16.mxu1 %v403_v45  ;;  %v472_v45 = vunpack.c.l.s8.bf16 %v168_v42  ;;  %v474_v46 = vunpack.c.l.s8.bf16 %v170_v44 }
 0x190   :  { %1227 = vmatpush1.bf16.msra.mxu0 %v400_v49  ;;  %v483_v49 = vunpack.c.h.s8.bf16 %v171_v39  ;;  %v209_v39 = vld [vmem:[#allocation7 + $0x2e8] sm:$0xff] }
 0x191   :  { %1391 = vmatpush1.bf16.msra.mxu1 %v402_v50  ;;  %1228 = vmatprep.subr.bf16.mxu0 %v409_v13  ;;  %v177_v50 = vld [vmem:[#allocation7 + $0x1e8] sm:$0xff]  ;;  %v179_v13 = vld [vmem:[#allocation7 + $0x1f8] sm:$0xff]  ;;  %v553_v42 = vunpack.c.l.s8.bf16 %v209_v39 }
 0x192   :  { %1392 = vmatprep.subr.bf16.mxu1 %v411_v53  ;;  %v482_v53 = vunpack.c.h.s8.bf16 %v170_v44  ;;  %v489_v54 = vunpack.c.l.s8.bf16 %v177_v50  ;;  %v497_v26 = vunpack.c.h.s8.bf16 %v177_v50 }
 0x194   :  { %1229 = vmatpush1.bf16.msra.mxu0 %v408_v12  ;;  %v176_v12 = vld [vmem:[#allocation7 + $0x1e0] sm:$0xff] }
 0x195   :  { %1393 = vmatpush1.bf16.msra.mxu1 %v410_v55  ;;  %1230 = vmatprep.subr.bf16.mxu0 %v417_v56  ;;  %v491_v55 = vunpack.c.l.s8.bf16 %v179_v13  ;;  %v178_v56 = vld [vmem:[#allocation7 + $0x1f0] sm:$0xff]  ;;  %v496_v62 = vunpack.c.h.s8.bf16 %v176_v12 }
 0x196   :  { %1394 = vmatprep.subr.bf16.mxu1 %v419_v57  ;;  %v488_v57 = vunpack.c.l.s8.bf16 %v176_v12  ;;  %v490_v58 = vunpack.c.l.s8.bf16 %v178_v56 }
 0x198   :  { %1231 = vmatpush1.bf16.msra.mxu0 %v416_v59  ;;  %v499_v59 = vunpack.c.h.s8.bf16 %v179_v13  ;;  %v217_v13 = vld [vmem:[#allocation7 + $0x328] sm:$0xff] }
 0x199   :  { %1395 = vmatpush1.bf16.msra.mxu1 %v418_v60  ;;  %1232 = vmatprep.subr.bf16.mxu0 %v425_v61  ;;  %v185_v60 = vld [vmem:[#allocation7 + $0x228] sm:$0xff]  ;;  %v187_v61 = vld [vmem:[#allocation7 + $0x238] sm:$0xff]  ;;  %v569_v12 = vunpack.c.l.s8.bf16 %v217_v13 }
 0x19a   :  { %1396 = vmatprep.subr.bf16.mxu1 %v427_v0  ;;  %v498_v0 = vunpack.c.h.s8.bf16 %v178_v56  ;;  %v505_v2 = vunpack.c.l.s8.bf16 %v185_v60  ;;  %v513_v8 = vunpack.c.h.s8.bf16 %v185_v60 }
 0x19c   :  { %1233 = vmatpush1.bf16.msra.mxu0 %v424_v3  ;;  %v184_v3 = vld [vmem:[#allocation7 + $0x220] sm:$0xff] }
 0x19d   :  { %1397 = vmatpush1.bf16.msra.mxu1 %v426_v4  ;;  %1234 = vmatprep.subr.bf16.mxu0 %v433_v5  ;;  %v507_v4 = vunpack.c.l.s8.bf16 %v187_v61  ;;  %v186_v5 = vld [vmem:[#allocation7 + $0x230] sm:$0xff]  ;;  %v512_v15 = vunpack.c.h.s8.bf16 %v184_v3 }
 0x19e   :  { %1398 = vmatprep.subr.bf16.mxu1 %v435_v6  ;;  %v504_v6 = vunpack.c.l.s8.bf16 %v184_v3  ;;  %v506_v7 = vunpack.c.l.s8.bf16 %v186_v5 }
 0x1a0   :  { %1235 = vmatpush1.bf16.msra.mxu0 %v432_v9  ;;  %v193_v9 = vld [vmem:[#allocation7 + $0x268] sm:$0xff] }
 0x1a1   :  { %1399 = vmatpush1.bf16.msra.mxu1 %v434_v11  ;;  %1236 = vmatprep.subr.bf16.mxu0 %v441_v10  ;;  %v515_v11 = vunpack.c.h.s8.bf16 %v187_v61  ;;  %v195_v10 = vld [vmem:[#allocation7 + $0x278] sm:$0xff]  ;;  %v521_v17 = vunpack.c.l.s8.bf16 %v193_v9  ;;  %v225_v61 = vld [vmem:[#allocation7 + $0x368] sm:$0xff] }
 0x1a2   :  { %1400 = vmatprep.subr.bf16.mxu1 %v443_v16  ;;  %v514_v16 = vunpack.c.h.s8.bf16 %v186_v5  ;;  %v531_v23 = vunpack.c.h.s8.bf16 %v195_v10  ;;  %v585_v3 = vunpack.c.l.s8.bf16 %v225_v61 }
 0x1a4   :  { %1237 = vmatpush1.bf16.msra.mxu0 %v440_v18  ;;  %v192_v18 = vld [vmem:[#allocation7 + $0x260] sm:$0xff] }
 0x1a5   :  { %1401 = vmatpush1.bf16.msra.mxu1 %v442_v19  ;;  %1238 = vmatprep.subr.bf16.mxu0 %v449_v20  ;;  %v523_v19 = vunpack.c.l.s8.bf16 %v195_v10  ;;  %v194_v20 = vld [vmem:[#allocation7 + $0x270] sm:$0xff]  ;;  %v233_v10 = vld [vmem:[#allocation7 + $0x3a8] sm:$0xff] }
 0x1a6   :  { %1402 = vmatprep.subr.bf16.mxu1 %v451_v21  ;;  %v520_v21 = vunpack.c.l.s8.bf16 %v192_v18  ;;  %v522_v22 = vunpack.c.l.s8.bf16 %v194_v20  ;;  %v530_v30 = vunpack.c.h.s8.bf16 %v194_v20 }
 0x1a8   :  { %1239 = vmatpush1.bf16.msra.mxu0 %v448_v24  ;;  %v201_v24 = vld [vmem:[#allocation7 + $0x2a8] sm:$0xff] }
 0x1a9   :  { %1403 = vmatpush1.bf16.msra.mxu1 %v450_v28  ;;  %1240 = vmatprep.subr.bf16.mxu0 %v457_v29  ;;  %v203_v28 = vld [vmem:[#allocation7 + $0x2b8] sm:$0xff]  ;;  %v528_v29 = vunpack.c.h.s8.bf16 %v192_v18  ;;  %v601_v18 = vunpack.c.l.s8.bf16 %v233_v10 }
 0x1aa   :  { %1404 = vmatprep.subr.bf16.mxu1 %v459_v32  ;;  %v200_v32 = vld [vmem:[#allocation7 + $0x2a0] sm:$0xff]  ;;  %v539_v33 = vunpack.c.l.s8.bf16 %v203_v28  ;;  %v547_v38 = vunpack.c.h.s8.bf16 %v203_v28  ;;  %v241_v28 = vld [vmem:[#allocation7 + $0x3e8] sm:$0xff] }
 0x1ac   :  { %1241 = vmatpush1.bf16.msra.mxu0 %v456_v34  ;;  %v202_v34 = vld [vmem:[#allocation7 + $0x2b0] sm:$0xff] }
 0x1ad   :  { %1405 = vmatpush1.bf16.msra.mxu1 %v458_v35  ;;  %1242 = vmatprep.subr.bf16.mxu0 %v465_v36  ;;  %v536_v35 = vunpack.c.l.s8.bf16 %v200_v32  ;;  %v538_v36 = vunpack.c.l.s8.bf16 %v202_v34 }
 0x1ae   :  { %1406 = vmatprep.subr.bf16.mxu1 %v467_v37  ;;  %v545_v37 = vunpack.c.h.s8.bf16 %v201_v24 }
 0x1b0   :  { %1243 = vmatpush1.bf16.msra.mxu0 %v464_v27  ;;  %v211_v27 = vld [vmem:[#allocation7 + $0x2f8] sm:$0xff] }
 0x1b1   :  { %1407 = vmatpush1.bf16.msra.mxu1 %v466_v40  ;;  %1244 = vmatprep.subr.bf16.mxu0 %v473_v41  ;;  %v544_v40 = vunpack.c.h.s8.bf16 %v200_v32  ;;  %v546_v41 = vunpack.c.h.s8.bf16 %v202_v34  ;;  %v555_v44 = vunpack.c.l.s8.bf16 %v211_v27  ;;  %v563_v50 = vunpack.c.h.s8.bf16 %v211_v27  ;;  %v249_v27 = vld [vmem:[#allocation7 + $0x428] sm:$0xff] }
 0x1b2   :  { %1408 = vmatprep.subr.bf16.mxu1 %v475_v43  ;;  %v208_v43 = vld [vmem:[#allocation7 + $0x2e0] sm:$0xff]  ;;  %v617_v32 = vunpack.c.l.s8.bf16 %v241_v28 }
 0x1b4   :  { %1245 = vmatpush1.bf16.msra.mxu0 %v472_v45  ;;  %v210_v45 = vld [vmem:[#allocation7 + $0x2f0] sm:$0xff] }
 0x1b5   :  { %1409 = vmatpush1.bf16.msra.mxu1 %v474_v46  ;;  %1246 = vmatprep.subr.bf16.mxu0 %v481_v48  ;;  %v552_v46 = vunpack.c.l.s8.bf16 %v208_v43  ;;  %v554_v48 = vunpack.c.l.s8.bf16 %v210_v45 }
 0x1b6   :  { %1410 = vmatprep.subr.bf16.mxu1 %v483_v49  ;;  %v561_v49 = vunpack.c.h.s8.bf16 %v209_v39 }
 0x1b8   :  { %1247 = vmatpush1.bf16.msra.mxu0 %v480_v52  ;;  %v219_v52 = vld [vmem:[#allocation7 + $0x338] sm:$0xff] }
 0x1b9   :  { %1411 = vmatpush1.bf16.msra.mxu1 %v482_v53  ;;  %1248 = vmatprep.subr.bf16.mxu0 %v489_v54  ;;  %v560_v53 = vunpack.c.h.s8.bf16 %v208_v43  ;;  %v562_v54 = vunpack.c.h.s8.bf16 %v210_v45  ;;  %v571_v56 = vunpack.c.l.s8.bf16 %v219_v52  ;;  %v579_v60 = vunpack.c.h.s8.bf16 %v219_v52 }
 0x1ba   :  { %1412 = vmatprep.subr.bf16.mxu1 %v491_v55  ;;  %v216_v55 = vld [vmem:[#allocation7 + $0x320] sm:$0xff]  ;;  %v633_v43 = vunpack.c.l.s8.bf16 %v249_v27 }
 0x1bc   :  { %1249 = vmatpush1.bf16.msra.mxu0 %v488_v57  ;;  %v218_v57 = vld [vmem:[#allocation7 + $0x330] sm:$0xff] }
 0x1bd   :  { %1413 = vmatpush1.bf16.msra.mxu1 %v490_v58  ;;  %1250 = vmatprep.subr.bf16.mxu0 %v497_v26  ;;  %v568_v58 = vunpack.c.l.s8.bf16 %v216_v55  ;;  %v570_v26 = vunpack.c.l.s8.bf16 %v218_v57 }
 0x1be   :  { %1414 = vmatprep.subr.bf16.mxu1 %v499_v59  ;;  %v577_v59 = vunpack.c.h.s8.bf16 %v217_v13  ;;  %v257_v13 = vld [vmem:[#allocation7 + $0x468] sm:$0xff] }
 0x1c0   :  { %1251 = vmatpush1.bf16.msra.mxu0 %v496_v62  ;;  %v227_v62 = vld [vmem:[#allocation7 + $0x378] sm:$0xff] }
 0x1c1   :  { %1415 = vmatpush1.bf16.msra.mxu1 %v498_v0  ;;  %1261 = vmatprep.subr.bf16.mxu0 %v505_v2  ;;  %v576_v0 = vunpack.c.h.s8.bf16 %v216_v55  ;;  %v578_v2 = vunpack.c.h.s8.bf16 %v218_v57  ;;  %v587_v5 = vunpack.c.l.s8.bf16 %v227_v62  ;;  %v649_v55 = vunpack.c.l.s8.bf16 %v257_v13 }
 0x1c2   :  { %1425 = vmatprep.subr.bf16.mxu1 %v507_v4  ;;  %v224_v4 = vld [vmem:[#allocation7 + $0x360] sm:$0xff] }
 0x1c3   :  { %1253 = vmatmul.mubr.bf16.vlgmr.msra.gmra.mrb[4].mxu0 %v1926_v14 }
 0x1c4   :  { %1417 = vmatmul.mubr.bf16.vlgmr.msra.gmra.mrb[4].mxu1 %v1926_v14  ;;  %1262 = vmatpush1.bf16.msra.mxu0 %v504_v6  ;;  %v529_v14 = vunpack.c.h.s8.bf16 %v193_v9  ;;  %v226_v6 = vld [vmem:[#allocation7 + $0x370] sm:$0xff]  ;;  %v593_v9 = vunpack.c.h.s8.bf16 %v225_v61  ;;  %v265_v61 = vld [vmem:[#allocation7 + $0x4a8] sm:$0xff] }
 0x1c5   :  { %1293 = vmatprep.mubr.bf16.mxu0 %v1934_v25  ;;  %1426 = vmatpush1.bf16.msra.mxu1 %v506_v7  ;;  %v584_v7 = vunpack.c.l.s8.bf16 %v224_v4 }
 0x1c6   :  { %1457 = vmatprep.mubr.bf16.mxu1 %v1934_v25  ;;  %1263 = vmatprep.subr.bf16.mxu0 %v513_v8  ;;  %v537_v25 = vunpack.c.l.s8.bf16 %v201_v24  ;;  %v586_v8 = vunpack.c.l.s8.bf16 %v226_v6 }
 0x1c7   :  { %1427 = vmatprep.subr.bf16.mxu1 %v515_v11  ;;  %v595_v11 = vunpack.c.h.s8.bf16 %v227_v62  ;;  %v267_v62 = vld [vmem:[#allocation7 + $0x4b8] sm:$0xff] }
 0x1c8   :  { %1264 = vmatpush1.bf16.msra.mxu0 %v512_v15  ;;  %v235_v15 = vld [vmem:[#allocation7 + $0x3b8] sm:$0xff] }
 0x1c9   :  { %1428 = vmatpush1.bf16.msra.mxu1 %v514_v16  ;;  %1265 = vmatprep.subr.bf16.mxu0 %v521_v17  ;;  %v592_v16 = vunpack.c.h.s8.bf16 %v224_v4  ;;  %v594_v17 = vunpack.c.h.s8.bf16 %v226_v6  ;;  %v603_v20 = vunpack.c.l.s8.bf16 %v235_v15  ;;  %v611_v24 = vunpack.c.h.s8.bf16 %v235_v15 }
 0x1ca   :  { %1429 = vmatprep.subr.bf16.mxu1 %v523_v19  ;;  %v232_v19 = vld [vmem:[#allocation7 + $0x3a0] sm:$0xff]  ;;  %v667_v4 = vunpack.c.l.s8.bf16 %v267_v62 }
 0x1cc   :  { %1266 = vmatpush1.bf16.msra.mxu0 %v520_v21  ;;  %v234_v21 = vld [vmem:[#allocation7 + $0x3b0] sm:$0xff] }
 0x1cd   :  { %1430 = vmatpush1.bf16.msra.mxu1 %v522_v22  ;;  %1267 = vmatprep.subr.bf16.mxu0 %v529_v14  ;;  %v600_v22 = vunpack.c.l.s8.bf16 %v232_v19  ;;  %v602_v14 = vunpack.c.l.s8.bf16 %v234_v21 }
 0x1ce   :  { %1431 = vmatprep.subr.bf16.mxu1 %v531_v23  ;;  %v609_v23 = vunpack.c.h.s8.bf16 %v233_v10  ;;  %v275_v10 = vld [vmem:[#allocation7 + $0x4f8] sm:$0xff] }
 0x1d0   :  { %1268 = vmatpush1.bf16.msra.mxu0 %v528_v29  ;;  %v243_v29 = vld [vmem:[#allocation7 + $0x3f8] sm:$0xff] }
 0x1d1   :  { %1432 = vmatpush1.bf16.msra.mxu1 %v530_v30  ;;  %1269 = vmatprep.subr.bf16.mxu0 %v537_v25  ;;  %v608_v30 = vunpack.c.h.s8.bf16 %v232_v19  ;;  %v610_v25 = vunpack.c.h.s8.bf16 %v234_v21  ;;  %v619_v34 = vunpack.c.l.s8.bf16 %v243_v29  ;;  %v627_v39 = vunpack.c.h.s8.bf16 %v243_v29 }
 0x1d2   :  { %1433 = vmatprep.subr.bf16.mxu1 %v539_v33  ;;  %v240_v33 = vld [vmem:[#allocation7 + $0x3e0] sm:$0xff]  ;;  %v683_v19 = vunpack.c.l.s8.bf16 %v275_v10 }
 0x1d4   :  { %1270 = vmatpush1.bf16.msra.mxu0 %v536_v35  ;;  %v242_v35 = vld [vmem:[#allocation7 + $0x3f0] sm:$0xff] }
 0x1d5   :  { %1434 = vmatpush1.bf16.msra.mxu1 %v538_v36  ;;  %1271 = vmatprep.subr.bf16.mxu0 %v545_v37  ;;  %v616_v36 = vunpack.c.l.s8.bf16 %v240_v33  ;;  %v618_v37 = vunpack.c.l.s8.bf16 %v242_v35 }
 0x1d6   :  { %1435 = vmatprep.subr.bf16.mxu1 %v547_v38  ;;  %v625_v38 = vunpack.c.h.s8.bf16 %v241_v28  ;;  %v283_v28 = vld [vmem:[#allocation7 + $0x538] sm:$0xff] }
 0x1d8   :  { %1272 = vmatpush1.bf16.msra.mxu0 %v544_v40  ;;  %v251_v40 = vld [vmem:[#allocation7 + $0x438] sm:$0xff] }
 0x1d9   :  { %1436 = vmatpush1.bf16.msra.mxu1 %v546_v41  ;;  %1273 = vmatprep.subr.bf16.mxu0 %v553_v42  ;;  %v624_v41 = vunpack.c.h.s8.bf16 %v240_v33  ;;  %v626_v42 = vunpack.c.h.s8.bf16 %v242_v35  ;;  %v635_v45 = vunpack.c.l.s8.bf16 %v251_v40  ;;  %v643_v52 = vunpack.c.h.s8.bf16 %v251_v40 }
 0x1da   :  { %1437 = vmatprep.subr.bf16.mxu1 %v555_v44  ;;  %v248_v44 = vld [vmem:[#allocation7 + $0x420] sm:$0xff]  ;;  %v699_v33 = vunpack.c.l.s8.bf16 %v283_v28 }
 0x1dc   :  { %1274 = vmatpush1.bf16.msra.mxu0 %v552_v46  ;;  %v250_v46 = vld [vmem:[#allocation7 + $0x430] sm:$0xff] }
 0x1dd   :  { %1438 = vmatpush1.bf16.msra.mxu1 %v554_v48  ;;  %1275 = vmatprep.subr.bf16.mxu0 %v561_v49  ;;  %v632_v48 = vunpack.c.l.s8.bf16 %v248_v44  ;;  %v634_v49 = vunpack.c.l.s8.bf16 %v250_v46 }
 0x1de   :  { %1439 = vmatprep.subr.bf16.mxu1 %v563_v50  ;;  %v641_v50 = vunpack.c.h.s8.bf16 %v249_v27  ;;  %v291_v27 = vld [vmem:[#allocation7 + $0x578] sm:$0xff] }
 0x1e0   :  { %1276 = vmatpush1.bf16.msra.mxu0 %v560_v53  ;;  %v259_v53 = vld [vmem:[#allocation7 + $0x478] sm:$0xff] }
 0x1e1   :  { %1440 = vmatpush1.bf16.msra.mxu1 %v562_v54  ;;  %1277 = vmatprep.subr.bf16.mxu0 %v569_v12  ;;  %v640_v54 = vunpack.c.h.s8.bf16 %v248_v44  ;;  %v642_v12 = vunpack.c.h.s8.bf16 %v250_v46  ;;  %v651_v57 = vunpack.c.l.s8.bf16 %v259_v53  ;;  %v715_v44 = vunpack.c.l.s8.bf16 %v291_v27 }
 0x1e2   :  { %1441 = vmatprep.subr.bf16.mxu1 %v571_v56  ;;  %v256_v56 = vld [vmem:[#allocation7 + $0x460] sm:$0xff] }
 0x1e4   :  { %1278 = vmatpush1.bf16.msra.mxu0 %v568_v58  ;;  %v258_v58 = vld [vmem:[#allocation7 + $0x470] sm:$0xff] }
 0x1e5   :  { %1442 = vmatpush1.bf16.msra.mxu1 %v570_v26  ;;  %1279 = vmatprep.subr.bf16.mxu0 %v577_v59  ;;  %v648_v26 = vunpack.c.l.s8.bf16 %v256_v56  ;;  %v650_v59 = vunpack.c.l.s8.bf16 %v258_v58 }
 0x1e6   :  { %1443 = vmatprep.subr.bf16.mxu1 %v579_v60  ;;  %v659_v60 = vunpack.c.h.s8.bf16 %v259_v53 }
 0x1e8   :  { %1280 = vmatpush1.bf16.msra.mxu0 %v576_v0  ;;  %v656_v0 = vunpack.c.h.s8.bf16 %v256_v56 }
 0x1e9   :  { %1444 = vmatpush1.bf16.msra.mxu1 %v578_v2  ;;  %1281 = vmatprep.subr.bf16.mxu0 %v585_v3  ;;  %v658_v2 = vunpack.c.h.s8.bf16 %v258_v58  ;;  %v264_v3 = vld [vmem:[#allocation7 + $0x4a0] sm:$0xff] }
 0x1ea   :  { %1445 = vmatprep.subr.bf16.mxu1 %v587_v5  ;;  %v266_v5 = vld [vmem:[#allocation7 + $0x4b0] sm:$0xff]  ;;  %v664_v6 = vunpack.c.l.s8.bf16 %v264_v3  ;;  %v672_v15 = vunpack.c.h.s8.bf16 %v264_v3 }
 0x1ec   :  { %1282 = vmatpush1.bf16.msra.mxu0 %v584_v7  ;;  %v666_v7 = vunpack.c.l.s8.bf16 %v266_v5 }
 0x1ed   :  { %1446 = vmatpush1.bf16.msra.mxu1 %v586_v8  ;;  %1283 = vmatprep.subr.bf16.mxu0 %v593_v9  ;;  %v673_v8 = vunpack.c.h.s8.bf16 %v265_v61  ;;  %v675_v9 = vunpack.c.h.s8.bf16 %v267_v62 }
 0x1ee   :  { %1447 = vmatprep.subr.bf16.mxu1 %v595_v11  ;;  %v273_v11 = vld [vmem:[#allocation7 + $0x4e8] sm:$0xff] }
 0x1f0   :  { %1284 = vmatpush1.bf16.msra.mxu0 %v592_v16  ;;  %v674_v16 = vunpack.c.h.s8.bf16 %v266_v5 }
 0x1f1   :  { %1448 = vmatpush1.bf16.msra.mxu1 %v594_v17  ;;  %1285 = vmatprep.subr.bf16.mxu0 %v601_v18  ;;  %v681_v17 = vunpack.c.l.s8.bf16 %v273_v11  ;;  %v272_v18 = vld [vmem:[#allocation7 + $0x4e0] sm:$0xff] }
 0x1f2   :  { %1449 = vmatprep.subr.bf16.mxu1 %v603_v20  ;;  %v274_v20 = vld [vmem:[#allocation7 + $0x4f0] sm:$0xff]  ;;  %v680_v21 = vunpack.c.l.s8.bf16 %v272_v18  ;;  %v688_v29 = vunpack.c.h.s8.bf16 %v272_v18 }
 0x1f4   :  { %1286 = vmatpush1.bf16.msra.mxu0 %v600_v22  ;;  %v682_v22 = vunpack.c.l.s8.bf16 %v274_v20 }
 0x1f5   :  { %1450 = vmatpush1.bf16.msra.mxu1 %v602_v14  ;;  %1287 = vmatprep.subr.bf16.mxu0 %v609_v23  ;;  %v689_v14 = vunpack.c.h.s8.bf16 %v273_v11  ;;  %v691_v23 = vunpack.c.h.s8.bf16 %v275_v10  ;;  %v315_v11 = vld [vmem:[#allocation7 + $0x638] sm:$0xff] }
 0x1f6   :  { %1451 = vmatprep.subr.bf16.mxu1 %v611_v24  ;;  %v281_v24 = vld [vmem:[#allocation7 + $0x528] sm:$0xff]  ;;  %v763_v18 = vunpack.c.l.s8.bf16 %v315_v11 }
 0x1f8   :  { %1288 = vmatpush1.bf16.msra.mxu0 %v608_v30  ;;  %v690_v30 = vunpack.c.h.s8.bf16 %v274_v20 }
 0x1f9   :  { %1452 = vmatpush1.bf16.msra.mxu1 %v610_v25  ;;  %1289 = vmatprep.subr.bf16.mxu0 %v617_v32  ;;  %v697_v25 = vunpack.c.l.s8.bf16 %v281_v24  ;;  %v280_v32 = vld [vmem:[#allocation7 + $0x520] sm:$0xff] }
 0x1fa   :  { %1453 = vmatprep.subr.bf16.mxu1 %v619_v34  ;;  %v282_v34 = vld [vmem:[#allocation7 + $0x530] sm:$0xff]  ;;  %v696_v35 = vunpack.c.l.s8.bf16 %v280_v32  ;;  %v704_v40 = vunpack.c.h.s8.bf16 %v280_v32 }
 0x1fc   :  { %1290 = vmatpush1.bf16.msra.mxu0 %v616_v36  ;;  %v698_v36 = vunpack.c.l.s8.bf16 %v282_v34 }
 0x1fd   :  { %1454 = vmatpush1.bf16.msra.mxu1 %v618_v37  ;;  %1291 = vmatprep.subr.bf16.mxu0 %v625_v38  ;;  %v705_v37 = vunpack.c.h.s8.bf16 %v281_v24  ;;  %v707_v38 = vunpack.c.h.s8.bf16 %v283_v28  ;;  %v323_v24 = vld [vmem:[#allocation7 + $0x678] sm:$0xff] }
 0x1fe   :  { %1455 = vmatprep.subr.bf16.mxu1 %v627_v39  ;;  %v289_v39 = vld [vmem:[#allocation7 + $0x568] sm:$0xff]  ;;  %v779_v32 = vunpack.c.l.s8.bf16 %v323_v24 }
 0x200   :  { %1292 = vmatpush1.bf16.msra.mxu0 %v624_v41  ;;  %v706_v41 = vunpack.c.h.s8.bf16 %v282_v34  ;;  %v1550_v34 = vlaneseq }
 0x201   :  { %1456 = vmatpush1.bf16.msra.mxu1 %v626_v42  ;;  %1302 = vmatprep.subr.bf16.mxu0 %v633_v43  ;;  %v713_v42 = vunpack.c.l.s8.bf16 %v289_v39  ;;  %v288_v43 = vld [vmem:[#allocation7 + $0x560] sm:$0xff] }
 0x202   :  { %1466 = vmatprep.subr.bf16.mxu1 %v635_v45  ;;  %v290_v45 = vld [vmem:[#allocation7 + $0x570] sm:$0xff]  ;;  %v712_v46 = vunpack.c.l.s8.bf16 %v288_v43  ;;  %v720_v53 = vunpack.c.h.s8.bf16 %v288_v43 }
 0x203   :  { %1294 = vmatmul.mubr.bf16.vlgmr.msra.gmra.mrb[4].mxu0 %v1944_v63 }
 0x204   :  { %1458 = vmatmul.mubr.bf16.vlgmr.msra.gmra.mrb[4].mxu1 %v1944_v63  ;;  %1303 = vmatpush1.bf16.msra.mxu0 %v632_v48  ;;  %v657_v63 = vunpack.c.h.s8.bf16 %v257_v13  ;;  %v714_v48 = vunpack.c.l.s8.bf16 %v290_v45  ;;  %v297_v13 = vld [vmem:[#allocation7 + $0x5a8] sm:$0xff] }
 0x205   :  { %1334 = vmatprep.mubr.bf16.mxu0 %v1948_v1  ;;  %1467 = vmatpush1.bf16.msra.mxu1 %v634_v49  ;;  %v721_v49 = vunpack.c.h.s8.bf16 %v289_v39  ;;  %v331_v39 = vld [vmem:[#allocation7 + $0x6b8] sm:$0xff] }
 0x206   :  { %1498 = vmatprep.mubr.bf16.mxu1 %v1948_v1  ;;  %1304 = vmatprep.subr.bf16.mxu0 %v641_v50  ;;  %v665_v1 = vunpack.c.l.s8.bf16 %v265_v61  ;;  %v723_v50 = vunpack.c.h.s8.bf16 %v291_v27  ;;  %v307_v61 = vld [vmem:[#allocation7 + $0x5f8] sm:$0xff]  ;;  %v1986_v27 = vshrl.u32 %v1550_v34, 7  ;;  %v795_v43 = vunpack.c.l.s8.bf16 %v331_v39 }
 0x207   :  { %1468 = vmatprep.subr.bf16.mxu1 %v643_v52  ;;  %v299_v52 = vld [vmem:[#allocation7 + $0x5b8] sm:$0xff]  ;;  %v747_v3 = vunpack.c.l.s8.bf16 %v307_v61 }
 0x208   :  { %1305 = vmatpush1.bf16.msra.mxu0 %v640_v54  ;;  %v722_v54 = vunpack.c.h.s8.bf16 %v290_v45  ;;  %v731_v56 = vunpack.c.l.s8.bf16 %v299_v52  ;;  %v1552_v45 = vsub.s32 0, %v1986_v27 }
 0x209   :  { %1469 = vmatpush1.bf16.msra.mxu1 %v642_v12  ;;  %1306 = vmatprep.subr.bf16.mxu0 %v649_v55  ;;  %v729_v12 = vunpack.c.l.s8.bf16 %v297_v13  ;;  %v296_v55 = vld [vmem:[#allocation7 + $0x5a0] sm:$0xff] }
 0x20a   :  { %1470 = vmatprep.subr.bf16.mxu1 %v651_v57  ;;  %v298_v57 = vld [vmem:[#allocation7 + $0x5b0] sm:$0xff]  ;;  %v728_v58 = vunpack.c.l.s8.bf16 %v296_v55  ;;  %v736_v62 = vunpack.c.h.s8.bf16 %v296_v55  ;;  %v337_v55 = vld [vmem:[#allocation7 + $0x6e8] sm:$0xff] }
 0x20c   :  { %1307 = vmatpush1.bf16.msra.mxu0 %v648_v26  ;;  %v730_v26 = vunpack.c.l.s8.bf16 %v298_v57 }
 0x20d   :  { %1471 = vmatpush1.bf16.msra.mxu1 %v650_v59  ;;  %1308 = vmatprep.subr.bf16.mxu0 %v657_v63  ;;  %v737_v59 = vunpack.c.h.s8.bf16 %v297_v13  ;;  %v739_v63 = vunpack.c.h.s8.bf16 %v299_v52  ;;  %v1564_v52 = vsub.s32 3, %v1986_v27 }
 0x20e   :  { %1472 = vmatprep.subr.bf16.mxu1 %v659_v60  ;;  %v305_v60 = vld [vmem:[#allocation7 + $0x5e8] sm:$0xff] }
 0x210   :  { %1309 = vmatpush1.bf16.msra.mxu0 %v656_v0  ;;  %v738_v0 = vunpack.c.h.s8.bf16 %v298_v57  ;;  %v1599_v57 = vld [vmem:[%s2041_s6 + $0x8] sm:$0xff] }
 0x211   :  { %1473 = vmatpush1.bf16.msra.mxu1 %v658_v2  ;;  %1310 = vmatprep.subr.bf16.mxu0 %v665_v1  ;;  %v745_v2 = vunpack.c.l.s8.bf16 %v305_v60  ;;  %v304_v1 = vld [vmem:[#allocation7 + $0x5e0] sm:$0xff] }
 0x212   :  { %1474 = vmatprep.subr.bf16.mxu1 %v667_v4  ;;  %v306_v4 = vld [vmem:[#allocation7 + $0x5f0] sm:$0xff]  ;;  %v744_v5 = vunpack.c.l.s8.bf16 %v304_v1  ;;  %v752_v10 = vunpack.c.h.s8.bf16 %v304_v1 }
 0x214   :  { %1311 = vmatpush1.bf16.msra.mxu0 %v664_v6  ;;  %v746_v6 = vunpack.c.l.s8.bf16 %v306_v4 }
 0x215   :  { %1475 = vmatpush1.bf16.msra.mxu1 %v666_v7  ;;  %1312 = vmatprep.subr.bf16.mxu0 %v673_v8  ;;  %v753_v7 = vunpack.c.h.s8.bf16 %v305_v60  ;;  %v755_v8 = vunpack.c.h.s8.bf16 %v307_v61 }
 0x216   :  { %1476 = vmatprep.subr.bf16.mxu1 %v675_v9  ;;  %v313_v9 = vld [vmem:[#allocation7 + $0x628] sm:$0xff] }
 0x218   :  { %1313 = vmatpush1.bf16.msra.mxu0 %v672_v15  ;;  %v754_v15 = vunpack.c.h.s8.bf16 %v306_v4 }
 0x219   :  { %1477 = vmatpush1.bf16.msra.mxu1 %v674_v16  ;;  %1314 = vmatprep.subr.bf16.mxu0 %v681_v17  ;;  %v761_v16 = vunpack.c.l.s8.bf16 %v313_v9  ;;  %v312_v17 = vld [vmem:[#allocation7 + $0x620] sm:$0xff] }
 0x21a   :  { %1478 = vmatprep.subr.bf16.mxu1 %v683_v19  ;;  %v314_v19 = vld [vmem:[#allocation7 + $0x630] sm:$0xff]  ;;  %v760_v20 = vunpack.c.l.s8.bf16 %v312_v17  ;;  %v768_v28 = vunpack.c.h.s8.bf16 %v312_v17 }
 0x21c   :  { %1315 = vmatpush1.bf16.msra.mxu0 %v680_v21  ;;  %v762_v21 = vunpack.c.l.s8.bf16 %v314_v19 }
 0x21d   :  { %1479 = vmatpush1.bf16.msra.mxu1 %v682_v22  ;;  %1316 = vmatprep.subr.bf16.mxu0 %v689_v14  ;;  %v769_v22 = vunpack.c.h.s8.bf16 %v313_v9  ;;  %v321_v14 = vld [vmem:[#allocation7 + $0x668] sm:$0xff] }
 0x21e   :  { %1480 = vmatprep.subr.bf16.mxu1 %v691_v23  ;;  %v771_v23 = vunpack.c.h.s8.bf16 %v315_v11  ;;  %v1605_v11 = vunpack.c.h.bf16 %v1599_v57 }
 0x220   :  { %1317 = vmatpush1.bf16.msra.mxu0 %v688_v29  ;;  %v770_v29 = vunpack.c.h.s8.bf16 %v314_v19 }
 0x221   :  { %1481 = vmatpush1.bf16.msra.mxu1 %v690_v30  ;;  %1318 = vmatprep.subr.bf16.mxu0 %v697_v25  ;;  %v777_v30 = vunpack.c.l.s8.bf16 %v321_v14  ;;  %v320_v25 = vld [vmem:[#allocation7 + $0x660] sm:$0xff] }
 0x222   :  { %1482 = vmatprep.subr.bf16.mxu1 %v699_v33  ;;  %v322_v33 = vld [vmem:[#allocation7 + $0x670] sm:$0xff] }
 0x224   :  { %1319 = vmatpush1.bf16.msra.mxu0 %v696_v35  ;;  %v776_v35 = vunpack.c.l.s8.bf16 %v320_v25 }
 0x225   :  { %1483 = vmatpush1.bf16.msra.mxu1 %v698_v36  ;;  %1320 = vmatprep.subr.bf16.mxu0 %v705_v37  ;;  %v785_v36 = vunpack.c.h.s8.bf16 %v321_v14  ;;  %v787_v37 = vunpack.c.h.s8.bf16 %v323_v24 }
 0x226   :  { %1484 = vmatprep.subr.bf16.mxu1 %v707_v38  ;;  %v329_v38 = vld [vmem:[#allocation7 + $0x6a8] sm:$0xff] }
 0x228   :  { %1321 = vmatpush1.bf16.msra.mxu0 %v704_v40  ;;  %v784_v40 = vunpack.c.h.s8.bf16 %v320_v25 }
 0x229   :  { %1485 = vmatpush1.bf16.msra.mxu1 %v706_v41  ;;  %1322 = vmatprep.subr.bf16.mxu0 %v713_v42  ;;  %v793_v41 = vunpack.c.l.s8.bf16 %v329_v38  ;;  %v328_v42 = vld [vmem:[#allocation7 + $0x6a0] sm:$0xff] }
 0x22a   :  { %1486 = vmatprep.subr.bf16.mxu1 %v715_v44  ;;  %v330_v44 = vld [vmem:[#allocation7 + $0x6b0] sm:$0xff] }
 0x22b   :  { %v794_v13 = vunpack.c.l.s8.bf16 %v330_v44 }
 0x22c   :  { %1323 = vmatpush1.bf16.msra.mxu0 %v712_v46  ;;  %v792_v46 = vunpack.c.l.s8.bf16 %v328_v42 }
 0x22d   :  { %1487 = vmatpush1.bf16.msra.mxu1 %v714_v48  ;;  %1324 = vmatprep.subr.bf16.mxu0 %v721_v49  ;;  %v1992_v48 = vld [vmem:[%s2040_s5] sm:$0xff]  ;;  %v1560_v49 = vsub.s32 2, %v1986_v27 }
 0x22e   :  { %1488 = vmatprep.subr.bf16.mxu1 %v723_v50  ;;  %v1556_v50 = vsub.s32 1, %v1986_v27  ;;  %v1565_v61 = vrot.slane %v1992_v48, %v1564_v52 }
 0x230   :  { %1325 = vmatpush1.bf16.msra.mxu0 %v720_v53  ;;  %v801_v53 = vunpack.c.h.s8.bf16 %v329_v38 }
 0x231   :  { %1489 = vmatpush1.bf16.msra.mxu1 %v722_v54  ;;  %1326 = vmatprep.subr.bf16.mxu0 %v729_v12  ;;  %v1598_v54 = vld [vmem:[%s2041_s6] sm:$0xff]  ;;  %v803_v12 = vunpack.c.h.s8.bf16 %v331_v39 }
 0x232   :  { %1490 = vmatprep.subr.bf16.mxu1 %v731_v56  ;;  %v1553_v56 = vrot.slane %v1992_v48, %v1552_v45  ;;  %v1602_v60 = vunpack.c.l.bf16 %v1598_v54  ;;  %v1603_v4 = vunpack.c.h.bf16 %v1598_v54 }
 0x234   :  { %1327 = vmatpush1.bf16.msra.mxu0 %v728_v58  ;;  %v339_v58 = vld [vmem:[#allocation7 + $0x6f8] sm:$0xff] }
 0x235   :  { %1491 = vmatpush1.bf16.msra.mxu1 %v730_v26  ;;  %1328 = vmatprep.subr.bf16.mxu0 %v737_v59  ;;  %v1561_v26 = vrot.slane %v1992_v48, %v1560_v49  ;;  %v1557_v59 = vrot.slane %v1992_v48, %v1556_v50  ;;  %v819_v34 = vunpack.c.h.s8.bf16 %v339_v58  ;;  %v346_v50 = vld [vmem:[#allocation7 + $0x730] sm:$0xff] }
 0x236   :  { %1492 = vmatprep.subr.bf16.mxu1 %v739_v63  ;;  %v800_v63 = vunpack.c.h.s8.bf16 %v328_v42 }
 0x238   :  { %1329 = vmatpush1.bf16.msra.mxu0 %v736_v62  ;;  %v802_v62 = vunpack.c.h.s8.bf16 %v330_v44  ;;  %v344_v44 = vld [vmem:[#allocation7 + $0x720] sm:$0xff] }
 0x239   :  { %1493 = vmatpush1.bf16.msra.mxu1 %v738_v0  ;;  %1330 = vmatprep.subr.bf16.mxu0 %v745_v2  ;;  %v809_v0 = vunpack.c.l.s8.bf16 %v337_v55  ;;  %v336_v2 = vld [vmem:[#allocation7 + $0x6e0] sm:$0xff]  ;;  %v824_v52 = vunpack.c.l.s8.bf16 %v344_v44 }
 0x23a   :  { %1494 = vmatprep.subr.bf16.mxu1 %v747_v3  ;;  %v1604_v3 = vunpack.c.l.bf16 %v1599_v57  ;;  %v808_v19 = vunpack.c.l.s8.bf16 %v336_v2  ;;  %v832_v57 = vunpack.c.h.s8.bf16 %v344_v44 }
 0x23c   :  { %1331 = vmatpush1.bf16.msra.mxu0 %v744_v5  ;;  %v811_v5 = vunpack.c.l.s8.bf16 %v339_v58  ;;  %v834_v58 = vunpack.c.h.s8.bf16 %v346_v50 }
 0x23d   :  { %1495 = vmatpush1.bf16.msra.mxu1 %v746_v6  ;;  %1332 = vmatprep.subr.bf16.mxu0 %v753_v7  ;;  %v338_v6 = vld [vmem:[#allocation7 + $0x6f0] sm:$0xff] }
 0x23e   :  { %1496 = vmatprep.subr.bf16.mxu1 %v755_v8  ;;  %v818_v42 = vunpack.c.h.s8.bf16 %v338_v6 }
 0x240   :  { %1333 = vmatpush1.bf16.msra.mxu0 %v752_v10  ;;  %v1623_v10 = vld [vmem:[#allocation5] sm:$0xff] }
 0x241   :  { %1497 = vmatpush1.bf16.msra.mxu1 %v754_v15  ;;  %1343 = vmatprep.subr.bf16.mxu0 %v761_v16 }
 0x242   :  { %1507 = vmatprep.subr.bf16.mxu1 %v763_v18 }
 0x243   :  { %1335 = vmatmul.mubr.bf16.vlgmr.msra.gmra.mrb[4].mxu0 %v1956_v47 }
 0x244   :  { %1499 = vmatmul.mubr.bf16.vlgmr.msra.gmra.mrb[4].mxu1 %v1956_v47  ;;  %1344 = vmatpush1.bf16.msra.mxu0 %v760_v20  ;;  %v778_v47 = vunpack.c.l.s8.bf16 %v322_v33 }
 0x245   :  { %1375 = vmatprep.mubr.bf16.mxu0 %v1961_v51  ;;  %1508 = vmatpush1.bf16.msra.mxu1 %v762_v21  ;;  %v1625_v21 = vld [vmem:[#allocation5 + $0x10] sm:$0xff] }
 0x246   :  { %1539 = vmatprep.mubr.bf16.mxu1 %v1961_v51  ;;  %1345 = vmatprep.subr.bf16.mxu0 %v769_v22  ;;  %v786_v51 = vunpack.c.h.s8.bf16 %v322_v33  ;;  %v1624_v22 = vld [vmem:[#allocation5 + $0x8] sm:$0xff] }
 0x247   :  { %1509 = vmatprep.subr.bf16.mxu1 %v771_v23 }
 0x248   :  { %1346 = vmatpush1.bf16.msra.mxu0 %v768_v28  ;;  %v810_v28 = vunpack.c.l.s8.bf16 %v338_v6 }
 0x249   :  { %1510 = vmatpush1.bf16.msra.mxu1 %v770_v29  ;;  %1347 = vmatprep.subr.bf16.mxu0 %v777_v30  ;;  %v817_v29 = vunpack.c.h.s8.bf16 %v337_v55  ;;  %v353_v55 = vld [vmem:[#allocation7 + $0x768] sm:$0xff] }
 0x24a   :  { %1511 = vmatprep.subr.bf16.mxu1 %v779_v32  ;;  %v1626_v32 = vld [vmem:[#allocation5 + $0x18] sm:$0xff] }
 0x24c   :  { %1348 = vmatpush1.bf16.msra.mxu0 %v776_v35  ;;  %v345_v35 = vld [vmem:[#allocation7 + $0x728] sm:$0xff] }
 0x24d   :  { %1512 = vmatpush1.bf16.msra.mxu1 %v778_v47  ;;  %1349 = vmatprep.subr.bf16.mxu0 %v785_v36  ;;  %v833_v54 = vunpack.c.h.s8.bf16 %v345_v35 }
 0x24e   :  { %1513 = vmatprep.subr.bf16.mxu1 %v787_v37  ;;  %v347_v37 = vld [vmem:[#allocation7 + $0x738] sm:$0xff] }
 0x24f   :  { %v827_v49 = vunpack.c.l.s8.bf16 %v347_v37 }
 0x250   :  { %1350 = vmatpush1.bf16.msra.mxu0 %v784_v40  ;;  %v816_v40 = vunpack.c.h.s8.bf16 %v336_v2 }
 0x251   :  { %1514 = vmatpush1.bf16.msra.mxu1 %v786_v51  ;;  %1351 = vmatprep.subr.bf16.mxu0 %v793_v41 }
 0x252   :  { %1515 = vmatprep.subr.bf16.mxu1 %v795_v43  ;;  %v825_v43 = vunpack.c.l.s8.bf16 %v345_v35  ;;  %v1572_v35 = vsub.s32 5, %v1986_v27 }
 0x254   :  { %1352 = vmatpush1.bf16.msra.mxu0 %v792_v46 }
 0x255   :  { %1516 = vmatpush1.bf16.msra.mxu1 %v794_v13  ;;  %1353 = vmatprep.subr.bf16.mxu0 %v801_v53  ;;  %v826_v53 = vunpack.c.l.s8.bf16 %v346_v50 }
 0x256   :  { %v1049_v1 = vpop.f32.mrb[0].mxu0  ;;  %1517 = vmatprep.subr.bf16.mxu1 %v803_v12  ;;  %v835_v12 = vunpack.c.h.s8.bf16 %v347_v37 }
 0x257   :  { %v1590_v7 = vmul.f32 %v1553_v56, %v1049_v1  ;;  %v1213_v8 = vpop.f32.mrb[0].mxu1  ;;  %v1051_v9 = vpop.f32.mrb[1].mxu0  ;;  %v355_v56 = vld [vmem:[#allocation7 + $0x778] sm:$0xff]  ;;  %v361_v1 = vld [vmem:[#allocation7 + $0x7a8] sm:$0xff] }
 0x258   :  { %v1592_v15 = vmul.f32 %v1561_v26, %v1213_v8  ;;  %v1591_v16 = vmul.f32 %v1557_v59, %v1051_v9  ;;  %v1215_v17 = vpop.f32.mrb[1].mxu1  ;;  %v1053_v18 = vpop.f32.mrb[2].mxu0  ;;  %1354 = vmatpush1.bf16.msra.mxu0 %v800_v63  ;;  %v841_v26 = vunpack.c.l.s8.bf16 %v353_v55  ;;  %v352_v59 = vld [vmem:[#allocation7 + $0x760] sm:$0xff]  ;;  %v843_v63 = vunpack.c.l.s8.bf16 %v355_v56  ;;  %v362_v9 = vld [vmem:[#allocation7 + $0x7b0] sm:$0xff] }
 0x259   :  { %v1610_v20 = vadd.f32 %v1602_v60, %v1590_v7  ;;  %v1593_v14 = vmul.f32 %v1565_v61, %v1215_v17  ;;  %v1217_v23 = vpop.f32.mrb[2].mxu1  ;;  %1518 = vmatpush1.bf16.msra.mxu1 %v802_v62  ;;  %v1054_v24 = vpop.f32.mrb[3].mxu0  ;;  %1355 = vmatprep.subr.bf16.mxu0 %v809_v0  ;;  %v354_v60 = vld [vmem:[#allocation7 + $0x770] sm:$0xff]  ;;  %v840_v61 = vunpack.c.l.s8.bf16 %v352_v59  ;;  %v849_v0 = vunpack.c.h.s8.bf16 %v353_v55  ;;  %v360_v7 = vld [vmem:[#allocation7 + $0x7a0] sm:$0xff]  ;;  %v369_v17 = vld [vmem:[#allocation7 + $0x7e8] sm:$0xff] }
 0x25a   :  { %v1612_v30 = vadd.f32 %v1604_v3, %v1592_v15  ;;  %v1611_v25 = vadd.f32 %v1603_v4, %v1591_v16  ;;  %v1218_v33 = vpop.f32.mrb[3].mxu1  ;;  %1519 = vmatprep.subr.bf16.mxu1 %v811_v5  ;;  %v842_v62 = vunpack.c.l.s8.bf16 %v354_v60  ;;  %v851_v2 = vunpack.c.h.s8.bf16 %v355_v56  ;;  %v363_v3 = vld [vmem:[#allocation7 + $0x7b8] sm:$0xff]  ;;  %v370_v23 = vld [vmem:[#allocation7 + $0x7f0] sm:$0xff]  ;;  %v1628_v55 = vld [vmem:[#allocation5 + $0x28] sm:$0xff] }
 0x25b   :  { %v1631_v47 = vsub.f32 %v1610_v20, %v1623_v10  ;;  %v1613_v36 = vadd.f32 %v1605_v11, %v1593_v14  ;;  %v848_v4 = vunpack.c.h.s8.bf16 %v352_v59  ;;  %v850_v5 = vunpack.c.h.s8.bf16 %v354_v60  ;;  %v371_v18 = vld [vmem:[#allocation7 + $0x7f8] sm:$0xff] }
 0x25c   :  { %v1633_v38 = vsub.f32 %v1612_v30, %v1625_v21  ;;  %v1632_v39 = vsub.f32 %v1611_v25, %v1624_v22  ;;  %1356 = vmatpush1.bf16.msra.mxu0 %v808_v19  ;;  %v857_v6 = vunpack.c.l.s8.bf16 %v361_v1  ;;  %v859_v8 = vunpack.c.l.s8.bf16 %v363_v3  ;;  %v368_v22 = vld [vmem:[#allocation7 + $0x7e0] sm:$0xff]  ;;  %v1630_v59 = vld [vmem:[#allocation5 + $0x38] sm:$0xff] }
 0x25d   :  { %v1639_v51 = vmul.f32 %v1631_v47, %v1631_v47  ;;  %v1634_v41 = vsub.f32 %v1613_v36, %v1626_v32  ;;  %1520 = vmatpush1.bf16.msra.mxu1 %v810_v28  ;;  %1357 = vmatprep.subr.bf16.mxu0 %v817_v29  ;;  %v856_v11 = vunpack.c.l.s8.bf16 %v360_v7  ;;  %v858_v10 = vunpack.c.l.s8.bf16 %v362_v9  ;;  %v1600_v36 = vld [vmem:[%s2041_s6 + $0x10] sm:$0xff] }
 0x25e   :  { %v1641_v45 = vmul.f32 %v1633_v38, %v1633_v38  ;;  %v1640_v46 = vmul.f32 %v1632_v39, %v1632_v39  ;;  %1521 = vmatprep.subr.bf16.mxu1 %v819_v34  ;;  %v865_v15 = vunpack.c.h.s8.bf16 %v361_v1  ;;  %v867_v16 = vunpack.c.h.s8.bf16 %v363_v3  ;;  %v1601_v38 = vld [vmem:[%s2041_s6 + $0x18] sm:$0xff]  ;;  %s1829_s6 = smov [#allocation8]  }
 0x25f   :  { %1647 = vst [vmem:[#allocation8] sm:$0xff] %v1639_v51  ;;  %v1642_v13 = vmul.f32 %v1634_v41, %v1634_v41  ;;  %v864_v19 = vunpack.c.h.s8.bf16 %v360_v7  ;;  %v866_v20 = vunpack.c.h.s8.bf16 %v362_v9  ;;  %v873_v21 = vunpack.c.l.s8.bf16 %v369_v17  ;;  %s1661_s23 = sshll.u32 %s1829_s6, 4  ;;  %s1662_s23 = int_to_ptr.vmem [resolvable:$true] %s1661_s23 }
 0x260   :  { %1649 = vst [vmem:[#allocation8 + $0x10] sm:$0xff] %v1641_v45  ;;  %1648 = vst [vmem:[#allocation8 + $0x8] sm:$0xff] %v1640_v46  ;;  %1358 = vmatpush1.bf16.msra.mxu0 %v816_v40  ;;  %v875_v14 = vunpack.c.l.s8.bf16 %v371_v18  ;;  %v872_v24 = vunpack.c.l.s8.bf16 %v368_v22  ;;  %v874_v28 = vunpack.c.l.s8.bf16 %v370_v23  ;;  %v881_v29 = vunpack.c.h.s8.bf16 %v369_v17  ;;  %s1795_s24 = scalar_lea.vmem %s1662_s23, 1024  ;;  %p1800_p11 = scmp.lt.s32.totalorder %s1662_s23, %s1662_s23 }
 0x261   :  { %1650 = vst [vmem:[#allocation8 + $0x18] sm:$0xff] %v1642_v13  ;;  %1522 = vmatpush1.bf16.msra.mxu1 %v818_v42  ;;  %1359 = vmatprep.subr.bf16.mxu0 %v825_v43  ;;  %v883_v30 = vunpack.c.h.s8.bf16 %v371_v18  ;;  %v880_v25 = vunpack.c.h.s8.bf16 %v368_v22  ;;  %v882_v32 = vunpack.c.h.s8.bf16 %v370_v23  ;;  %v1568_v33 = vsub.s32 4, %v1986_v27  ;;  %p1796_p10 = scmp.ne.s32.totalorder %s1662_s23, %s1795_s24  ;;  %p1801_p12 = scmp.lt.s32.totalorder %s1795_s24, %s1795_s24 }
 0x262   :  { %1523 = vmatprep.subr.bf16.mxu1 %v827_v49  ;;  %v1576_v34 = vsub.s32 6, %v1986_v27  ;;  %v1580_v47 = vsub.s32 7, %v1986_v27  ;;  %v1573_v39 = vrot.slane %v1992_v48, %v1572_v35  ;;  %v1606_v40 = vunpack.c.l.bf16 %v1600_v36  ;;  %v1627_v49 = vld [vmem:[#allocation5 + $0x20] sm:$0xff] }
 0x263   :  { %v1569_v37 = vrot.slane %v1992_v48, %v1568_v33  ;;  %v1608_v42 = vunpack.c.l.bf16 %v1601_v38  ;;  %v1607_v27 = vunpack.c.h.bf16 %v1600_v36  ;;  %v1609_v46 = vunpack.c.h.bf16 %v1601_v38  ;;  %p1802_p13 = por %p1801_p12, %p1800_p11 }
 0x264   :  { %1360 = vmatpush1.bf16.msra.mxu0 %v824_v52  ;;  %v1581_v51 = vrot.slane %v1992_v48, %v1580_v47 }
 0x265   :  { %1524 = vmatpush1.bf16.msra.mxu1 %v826_v53  ;;  %1361 = vmatprep.subr.bf16.mxu0 %v833_v54  ;;  %p1803_p0 = pnand %p1802_p13, %p1796_p10 }
 0x266   :  { %1525 = vmatprep.subr.bf16.mxu1 %v835_v12  ;;  %v1629_v12 = vld [vmem:[#allocation5 + $0x30] sm:$0xff] }
 0x268   :  { %1362 = vmatpush1.bf16.msra.mxu0 %v832_v57 }
 0x269   :  { %1526 = vmatpush1.bf16.msra.mxu1 %v834_v58  ;;  %1363 = vmatprep.subr.bf16.mxu0 %v841_v26 }
 0x26a   :  { %1527 = vmatprep.subr.bf16.mxu1 %v843_v63 }
 0x26c   :  { %1364 = vmatpush1.bf16.msra.mxu0 %v840_v61 }
 0x26d   :  { %1528 = vmatpush1.bf16.msra.mxu1 %v842_v62  ;;  %1365 = vmatprep.subr.bf16.mxu0 %v849_v0 }
 0x26e   :  { %1529 = vmatprep.subr.bf16.mxu1 %v851_v2 }
 0x270   :  { %1366 = vmatpush1.bf16.msra.mxu0 %v848_v4 }
 0x271   :  { %1530 = vmatpush1.bf16.msra.mxu1 %v850_v5  ;;  %1367 = vmatprep.subr.bf16.mxu0 %v857_v6 }
 0x272   :  { %1531 = vmatprep.subr.bf16.mxu1 %v859_v8 }
 0x274   :  { %1368 = vmatpush1.bf16.msra.mxu0 %v856_v11 }
 0x275   :  { %1532 = vmatpush1.bf16.msra.mxu1 %v858_v10  ;;  %1369 = vmatprep.subr.bf16.mxu0 %v865_v15 }
 0x276   :  { %1533 = vmatprep.subr.bf16.mxu1 %v867_v16 }
 0x278   :  { %1370 = vmatpush1.bf16.msra.mxu0 %v864_v19 }
 0x279   :  { %1534 = vmatpush1.bf16.msra.mxu1 %v866_v20  ;;  %1371 = vmatprep.subr.bf16.mxu0 %v873_v21 }
 0x27a   :  { %1535 = vmatprep.subr.bf16.mxu1 %v875_v14 }
 0x27c   :  { %1372 = vmatpush1.bf16.msra.mxu0 %v872_v24 }
 0x27d   :  { %1536 = vmatpush1.bf16.msra.mxu1 %v874_v28  ;;  %1373 = vmatprep.subr.bf16.mxu0 %v881_v29 }
 0x27e   :  { %1537 = vmatprep.subr.bf16.mxu1 %v883_v30 }
 0x280   :  { %1374 = vmatpush1.bf16.msra.mxu0 %v880_v25 }
 0x281   :  { %1538 = vmatpush1.bf16.msra.mxu1 %v882_v32 }
 0x283   :  { %1376 = vmatmul.mubr.bf16.vlgmr.msra.gmra.mrb[4].mxu0 %v1968_v31 }
 0x284   :  { %1540 = vmatmul.mubr.bf16.vlgmr.msra.gmra.mrb[4].mxu1 %v1968_v31  ;;  %v1577_v31 = vrot.slane %v1992_v48, %v1576_v34 }
 0x356   :  { %v1377_v41 = vpop.f32.mrb[4].mxu0 }
 0x357   :  { %v1594_v43 = vmul.f32 %v1569_v37, %v1377_v41  ;;  %v1541_v44 = vpop.f32.mrb[4].mxu1  ;;  %v1379_v45 = vpop.f32.mrb[5].mxu0 }
 0x358   :  { %v1596_v50 = vmul.f32 %v1577_v31, %v1541_v44  ;;  %v1595_v13 = vmul.f32 %v1573_v39, %v1379_v45  ;;  %v1543_v52 = vpop.f32.mrb[5].mxu1  ;;  %v1381_v53 = vpop.f32.mrb[6].mxu0 }
 0x359   :  { %v1614_v54 = vadd.f32 %v1606_v40, %v1594_v43  ;;  %v1597_v56 = vmul.f32 %v1581_v51, %v1543_v52  ;;  %v1545_v57 = vpop.f32.mrb[6].mxu1  ;;  %v1382_v58 = vpop.f32.mrb[7].mxu0 }
 0x35a   :  { %v1616_v26 = vadd.f32 %v1608_v42, %v1596_v50  ;;  %v1615_v48 = vadd.f32 %v1607_v27, %v1595_v13  ;;  %v1546_v63 = vpop.f32.mrb[7].mxu1 }
 0x35b   :  { %v1635_v60 = vsub.f32 %v1614_v54, %v1627_v49  ;;  %v1617_v61 = vadd.f32 %v1609_v46, %v1597_v56 }
 0x35c   :  { %v1637_v62 = vsub.f32 %v1616_v26, %v1629_v12  ;;  %v1636_v0 = vsub.f32 %v1615_v48, %v1628_v55 }
 0x35d   :  { %v1643_v2 = vmul.f32 %v1635_v60, %v1635_v60  ;;  %v1638_v1 = vsub.f32 %v1617_v61, %v1630_v59 }
 0x35e   :  { %v1645_v3 = vmul.f32 %v1637_v62, %v1637_v62  ;;  %v1644_v4 = vmul.f32 %v1636_v0, %v1636_v0 }
 0x35f   :  { %1651 = vst [vmem:[#allocation8 + $0x20] sm:$0xff] %v1643_v2  ;;  %v1646_v5 = vmul.f32 %v1638_v1, %v1638_v1 }
 0x360   :  { %1653 = vst [vmem:[#allocation8 + $0x30] sm:$0xff] %v1645_v3  ;;  %1652 = vst [vmem:[#allocation8 + $0x28] sm:$0xff] %v1644_v4 }
 0x361   :  { %1654 = vst [vmem:[#allocation8 + $0x38] sm:$0xff] %v1646_v5 }
 0x362   :  { %1806 = shalt.err (!%p1803_p0)
}
 0x363   :  { %s1807_s28 = scalar_lea.hbm %s2042_s7, 1024 }
 0x364   :  { %p1808_p1 = scmp.ne.s32.totalorder %s2042_s7, %s1807_s28  ;;  %p1811_p2 = scmp.lt.u32.totalorder %s1807_s28, %s2042_s7 }
 0x366   :  { %p1813_p3 = pnand %p1811_p2, %p1808_p1 }
 0x368   :  { %1816 = shalt.err (!%p1813_p3)
}
 0x369   :  { %1664 = dma.vmem_to_hbm [thread:$0]  %s1662_s23, 1024, %s2042_s7, [#allocation4]  }
 0x36a   :  { %1821 = dma.done.wait [#allocation4], 1024  }
 0x36b   :  { %1822 = vsyncadd [#allocation4], 4294966272 }
 0x36c   :  { %1668 = vsyncpa [#allocation3], 1 }
 0x36d   :  { %1669 = vsyncpa [#allocation6], 1 }
 0x36e   :  { %1670 = vsyncpa [#allocation4], 1 }

</bundles_post_ra>
